<compile_context>
chip_gen: v5e
topology: v5e:2x2
jax: 0.10.0
libtpu: 0.0.40
codegen_flags: <defaults>
</compile_context>

<pallas_src>
import jax
import jax.numpy as jnp
import numpy as np
from jax.experimental import pallas as pl
from jax.experimental.pallas import tpu as pltpu

# ----------------------------- model config ---------------------------------
B = 2                                   # per-branch batch
C = 4                                   # input channels
H = W = 16                              # spatial
K = 3                                   # conv kernel size
STRIDE = 2
C1 = 16                                 # conv output channels
OH = OW = (H - K) // STRIDE + 1         # 7
POS = OH * OW                           # 49 positions per sample
CKK = C * K * K                         # 36 im2col contraction size
FEAT = C1 * POS                         # 784 (PyTorch channel-major flatten)
HID = 64
EMB = 32
NB = 3 * B                              # 6  stacked triplet batch
NB_PAD = 8                              # stacked batch padded to one sublane tile
ROWS = POS * NB_PAD                     # 392 im2col rows (position-major)

_FLOPS = 2 * (ROWS * CKK * C1 + POS * NB_PAD * C1 * HID + NB_PAD * HID * EMB)
_BYTES = (ROWS * CKK * 2 + CKK * C1 * 2 + C1 * 4 + POS * C1 * HID * 2
          + HID * 4 + HID * EMB * 2 + EMB * 4 + NB_PAD * EMB * 4)


# ----------------------------- fused Pallas kernel --------------------------
def fused_embedding_kernel(p_ref, wc_ref, bc_ref, w1_ref, b1_ref, w2_ref,
                           b2_ref, o_ref):
    """Conv(im2col matmul)+ReLU -> Linear -> ReLU -> Linear in one kernel."""
    # Conv: one (392, 36) @ (36, 16) MXU matmul; bias + ReLU in f32.
    conv = jnp.dot(p_ref[...], wc_ref[...], preferred_element_type=jnp.float32)
    conv = jnp.maximum(conv + bc_ref[...], 0.0).astype(jnp.bfloat16)   # (392, 16)

    # Linear1 contracts over (position, channel).  Rows are position-major
    # (row = p*8 + n), so conv[p*8:(p+1)*8, :] is a single sublane-tile slice
    # (no relayout) and we accumulate 49 small (8,16)@(16,64) matmuls in f32.
    h = jnp.zeros((NB_PAD, HID), jnp.float32)
    for p in range(POS):                       # static unroll, tiny bodies
        h = h + jnp.dot(conv[p * NB_PAD:(p + 1) * NB_PAD, :], w1_ref[p],
                        preferred_element_type=jnp.float32)
    h = jnp.maximum(h + b1_ref[...], 0.0).astype(jnp.bfloat16)         # (8, 64)

    out = jnp.dot(h, w2_ref[...], preferred_element_type=jnp.float32) + b2_ref[...]
    o_ref[...] = out.astype(o_ref.dtype)                               # (8, 32)


def _full(shape):
    return pl.BlockSpec(shape, lambda i, _n=len(shape): (0,) * _n)


def fused_embed(patches, wc, bc, w1_pm, b1, w2, b2):
    return pl.pallas_call(
        fused_embedding_kernel,
        out_shape=jax.ShapeDtypeStruct((NB_PAD, EMB), jnp.float32),
        grid=(1,),
        in_specs=[_full(patches.shape), _full(wc.shape), _full(bc.shape),
                  _full(w1_pm.shape), _full(b1.shape), _full(w2.shape),
                  _full(b2.shape)],
        out_specs=_full((NB_PAD, EMB)),
        compiler_params=pltpu.CompilerParams(dimension_semantics=("arbitrary",)),
        cost_estimate=pl.CostEstimate(flops=_FLOPS, transcendentals=0,
                                      bytes_accessed=_BYTES),
    )(patches, wc, bc, w1_pm, b1, w2, b2)


# ----------------------------- glue (plain JAX, inside one jit) -------------
def im2col_pmajor(x):
    """(NB, C, H, W) -> (POS*NB_PAD, CKK) patches, position-major rows.

    Column order c*K*K + kh*K + kw matches PyTorch Conv2d
    weight.reshape(Cout, -1); the batch dim is zero-padded 6 -> 8 so each
    position's 8 sample rows form exactly one sublane tile in the kernel.
    """
    cols = [x[:, :, kh:kh + STRIDE * OH:STRIDE, kw:kw + STRIDE * OW:STRIDE]
            for kh in range(K) for kw in range(K)]            # 9 x (NB, C, 7, 7)
    p = jnp.stack(cols, axis=2)                               # (NB, C, 9, OH, OW)
    p = p.transpose(3, 4, 0, 1, 2)                            # (OH, OW, NB, C, 9)
    p = p.reshape(POS, NB, CKK)                               # (49, 6, 36)
    p = jnp.pad(p, ((0, 0), (0, NB_PAD - NB), (0, 0)))        # (49, 8, 36)
    return p.reshape(ROWS, CKK)                               # (392, 36)


@jax.jit
def triplet_net_forward(x1, x2, x3, params):
    """TripletNet.forward: shared embedding net applied to three inputs.

    The three branches are batched into one pass -> exactly ONE pallas_call.
    """
    wc, bc, w1_pm, b1, w2, b2 = params
    x = jnp.concatenate([x1, x2, x3], axis=0).astype(jnp.bfloat16)   # (6, C, H, W)
    patches = im2col_pmajor(x)                                       # (392, 36) bf16
    out = fused_embed(patches, wc, bc, w1_pm, b1, w2, b2)            # (8, EMB) f32
    return out[:B], out[B:2 * B], out[2 * B:NB]                      # drop pad rows


# ----------------------------- params ----------------------------------------
def init_reference_params(key):
    """Canonical (PyTorch-equivalent) parameter layout."""
    k = jax.random.split(key, 6)
    wc = jax.random.normal(k[0], (CKK, C1), jnp.float32) * 0.1      # row = c*9+kh*3+kw
    bc = jax.random.normal(k[1], (1, C1), jnp.float32) * 0.01
    w1 = jax.random.normal(k[2], (FEAT, HID), jnp.float32) * 0.05   # row = c1*49 + p
    b1 = jax.random.normal(k[3], (1, HID), jnp.float32) * 0.01
    w2 = jax.random.normal(k[4], (HID, EMB), jnp.float32) * 0.05
    b2 = jax.random.normal(k[5], (1, EMB), jnp.float32) * 0.01
    return wc, bc, w1, b1, w2, b2


def pack_params(ref_params):
    """Static repack: matmul weights -> bf16; w1 permuted to (POS, C1, HID) so
    the kernel's position-major conv rows feed it with no relayout.  Biases
    stay f32 (bias + ReLU are done in f32)."""
    wc, bc, w1, b1, w2, b2 = ref_params
    w1_pm = jnp.transpose(w1.reshape(C1, POS, HID), (1, 0, 2))      # (49, 16, 64)
    return (wc.astype(jnp.bfloat16), bc, w1_pm.astype(jnp.bfloat16), b1,
            w2.astype(jnp.bfloat16), b2)


# ----------------------------- pure-JAX reference ----------------------------
def reference_embedding(x_nchw, ref_params):
    """Plain-JAX embedding net in the original (unpadded, channel-major) layout."""
    wc, bc, w1, b1, w2, b2 = ref_params
    n = x_nchw.shape[0]
    cols = []
    for kh in range(K):
        for kw in range(K):
            cols.append(
                x_nchw[:, :, kh:kh + STRIDE * OH:STRIDE, kw:kw + STRIDE * OW:STRIDE])
    p = jnp.stack(cols, axis=2).transpose(0, 3, 4, 1, 2).reshape(n * POS, CKK)
    conv = jnp.maximum(jnp.dot(p, wc, precision="highest") + bc, 0.0)
    feats = conv.reshape(n, POS, C1).transpose(0, 2, 1).reshape(n, FEAT)
    h = jnp.maximum(jnp.dot(feats, w1, precision="highest") + b1, 0.0)
    return jnp.dot(h, w2, precision="highest") + b2


if __name__ == "__main__":
    root = jax.random.PRNGKey(0)
    kp, k1, k2, k3 = jax.random.split(root, 4)
    ref_params = init_reference_params(kp)
    params = pack_params(ref_params)

    x1 = jax.random.normal(k1, (B, C, H, W), jnp.float32)
    x2 = jax.random.normal(k2, (B, C, H, W), jnp.float32)
    x3 = jax.random.normal(k3, (B, C, H, W), jnp.float32)

    o1, o2, o3 = triplet_net_forward(x1, x2, x3, params)
    jax.block_until_ready((o1, o2, o3))

    assert o1.shape == (B, EMB) and o2.shape == (B, EMB) and o3.shape == (B, EMB)

    # Correctness: fused Pallas path (bf16 operands, f32 accumulation,
    # position-major packing) == plain-JAX f32 reference.
    for o, x in ((o1, x1), (o2, x2), (o3, x3)):
        r = reference_embedding(x, ref_params)
        np.testing.assert_allclose(np.asarray(o), np.asarray(r), rtol=2e-2, atol=2e-2)

    print("KERNEL_OK")
</pallas_src>

<mosaic_0001>
module attributes {stable_mosaic.version = 11 : i64} {
  func.func @fused_embedding_kernel(%arg0: i32, %arg1: memref<392x36xbf16, #tpu.memory_space<vmem>>, %arg2: memref<36x16xbf16, #tpu.memory_space<vmem>>, %arg3: memref<1x16xf32, #tpu.memory_space<vmem>>, %arg4: memref<49x16x64xbf16, #tpu.memory_space<vmem>>, %arg5: memref<1x64xf32, #tpu.memory_space<vmem>>, %arg6: memref<64x32xbf16, #tpu.memory_space<vmem>>, %arg7: memref<1x32xf32, #tpu.memory_space<vmem>>, %arg8: memref<8x32xf32, #tpu.memory_space<vmem>>) attributes {dimension_semantics = [#tpu.dimension_semantics<arbitrary>], iteration_bounds = array<i64: 1>, scalar_prefetch = 0 : i64, scratch_operands = 0 : i64, tpu.core_type = #tpu.core_type<tc>, window_params = [{pipeline_mode = #tpu.pipeline_mode<synchronous>, transform_indices = @transform_0, window_bounds = array<i64: 392, 36>}, {pipeline_mode = #tpu.pipeline_mode<synchronous>, transform_indices = @transform_1, window_bounds = array<i64: 36, 16>}, {pipeline_mode = #tpu.pipeline_mode<synchronous>, transform_indices = @transform_2, window_bounds = array<i64: 1, 16>}, {pipeline_mode = #tpu.pipeline_mode<synchronous>, transform_indices = @transform_3, window_bounds = array<i64: 49, 16, 64>}, {pipeline_mode = #tpu.pipeline_mode<synchronous>, transform_indices = @transform_4, window_bounds = array<i64: 1, 64>}, {pipeline_mode = #tpu.pipeline_mode<synchronous>, transform_indices = @transform_5, window_bounds = array<i64: 64, 32>}, {pipeline_mode = #tpu.pipeline_mode<synchronous>, transform_indices = @transform_6, window_bounds = array<i64: 1, 32>}, {pipeline_mode = #tpu.pipeline_mode<synchronous>, transform_indices = @transform_7, window_bounds = array<i64: 8, 32>}]} {
    %c0 = arith.constant 0 : index
    %c0_0 = arith.constant 0 : index
    %0 = vector.load %arg1[%c0, %c0_0] : memref<392x36xbf16, #tpu.memory_space<vmem>>, vector<392x36xbf16>
    %c0_1 = arith.constant 0 : index
    %c0_2 = arith.constant 0 : index
    %1 = vector.load %arg2[%c0_1, %c0_2] : memref<36x16xbf16, #tpu.memory_space<vmem>>, vector<36x16xbf16>
    %cst = arith.constant dense<0.000000e+00> : vector<392x16xf32>
    %2 = tpu.matmul %0, %1, %cst {dimension_numbers = #tpu.dot_dimension_numbers<[1], [0], [0], [1], [0, 0, 1, 1], [], []>} : vector<392x36xbf16>, vector<36x16xbf16>, vector<392x16xf32> -> vector<392x16xf32>
    %c0_3 = arith.constant 0 : index
    %c0_4 = arith.constant 0 : index
    %3 = vector.load %arg3[%c0_3, %c0_4] : memref<1x16xf32, #tpu.memory_space<vmem>>, vector<1x16xf32>
    %4 = vector.broadcast %3 : vector<1x16xf32> to vector<392x16xf32>
    %5 = arith.addf %2, %4 : vector<392x16xf32>
    %cst_5 = arith.constant 0.000000e+00 : f32
    %6 = vector.broadcast %cst_5 : f32 to vector<392x16xf32>
    %7 = arith.maximumf %5, %6 : vector<392x16xf32>
    %8 = arith.truncf %7 : vector<392x16xf32> to vector<392x16xbf16>
    %cst_6 = arith.constant 0.000000e+00 : f32
    %9 = vector.broadcast %cst_6 : f32 to vector<8x64xf32>
    %10 = vector.extract_strided_slice %8 {offsets = [0, 0], sizes = [8, 16], strides = [1, 1]} : vector<392x16xbf16> to vector<8x16xbf16>
    %c0_7 = arith.constant 0 : index
    %c0_8 = arith.constant 0 : index
    %c0_9 = arith.constant 0 : index
    %11 = vector.load %arg4[%c0_7, %c0_8, %c0_9] : memref<49x16x64xbf16, #tpu.memory_space<vmem>>, vector<1x16x64xbf16>
    %12 = vector.shape_cast %11 : vector<1x16x64xbf16> to vector<16x64xbf16>
    %cst_10 = arith.constant dense<0.000000e+00> : vector<8x64xf32>
    %13 = tpu.matmul %10, %12, %cst_10 {dimension_numbers = #tpu.dot_dimension_numbers<[1], [0], [0], [1], [0, 0, 1, 1], [], []>} : vector<8x16xbf16>, vector<16x64xbf16>, vector<8x64xf32> -> vector<8x64xf32>
    %14 = arith.addf %9, %13 : vector<8x64xf32>
    %15 = vector.extract_strided_slice %8 {offsets = [8, 0], sizes = [8, 16], strides = [1, 1]} : vector<392x16xbf16> to vector<8x16xbf16>
    %c1 = arith.constant 1 : index
    %c0_11 = arith.constant 0 : index
    %c0_12 = arith.constant 0 : index
    %16 = vector.load %arg4[%c1, %c0_11, %c0_12] : memref<49x16x64xbf16, #tpu.memory_space<vmem>>, vector<1x16x64xbf16>
    %17 = vector.shape_cast %16 : vector<1x16x64xbf16> to vector<16x64xbf16>
    %cst_13 = arith.constant dense<0.000000e+00> : vector<8x64xf32>
    %18 = tpu.matmul %15, %17, %cst_13 {dimension_numbers = #tpu.dot_dimension_numbers<[1], [0], [0], [1], [0, 0, 1, 1], [], []>} : vector<8x16xbf16>, vector<16x64xbf16>, vector<8x64xf32> -> vector<8x64xf32>
    %19 = arith.addf %14, %18 : vector<8x64xf32>
    %20 = vector.extract_strided_slice %8 {offsets = [16, 0], sizes = [8, 16], strides = [1, 1]} : vector<392x16xbf16> to vector<8x16xbf16>
    %c2 = arith.constant 2 : index
    %c0_14 = arith.constant 0 : index
    %c0_15 = arith.constant 0 : index
    %21 = vector.load %arg4[%c2, %c0_14, %c0_15] : memref<49x16x64xbf16, #tpu.memory_space<vmem>>, vector<1x16x64xbf16>
    %22 = vector.shape_cast %21 : vector<1x16x64xbf16> to vector<16x64xbf16>
    %cst_16 = arith.constant dense<0.000000e+00> : vector<8x64xf32>
    %23 = tpu.matmul %20, %22, %cst_16 {dimension_numbers = #tpu.dot_dimension_numbers<[1], [0], [0], [1], [0, 0, 1, 1], [], []>} : vector<8x16xbf16>, vector<16x64xbf16>, vector<8x64xf32> -> vector<8x64xf32>
    %24 = arith.addf %19, %23 : vector<8x64xf32>
    %25 = vector.extract_strided_slice %8 {offsets = [24, 0], sizes = [8, 16], strides = [1, 1]} : vector<392x16xbf16> to vector<8x16xbf16>
    %c3 = arith.constant 3 : index
    %c0_17 = arith.constant 0 : index
    %c0_18 = arith.constant 0 : index
    %26 = vector.load %arg4[%c3, %c0_17, %c0_18] : memref<49x16x64xbf16, #tpu.memory_space<vmem>>, vector<1x16x64xbf16>
    %27 = vector.shape_cast %26 : vector<1x16x64xbf16> to vector<16x64xbf16>
    %cst_19 = arith.constant dense<0.000000e+00> : vector<8x64xf32>
    %28 = tpu.matmul %25, %27, %cst_19 {dimension_numbers = #tpu.dot_dimension_numbers<[1], [0], [0], [1], [0, 0, 1, 1], [], []>} : vector<8x16xbf16>, vector<16x64xbf16>, vector<8x64xf32> -> vector<8x64xf32>
    %29 = arith.addf %24, %28 : vector<8x64xf32>
    %30 = vector.extract_strided_slice %8 {offsets = [32, 0], sizes = [8, 16], strides = [1, 1]} : vector<392x16xbf16> to vector<8x16xbf16>
    %c4 = arith.constant 4 : index
    %c0_20 = arith.constant 0 : index
    %c0_21 = arith.constant 0 : index
    %31 = vector.load %arg4[%c4, %c0_20, %c0_21] : memref<49x16x64xbf16, #tpu.memory_space<vmem>>, vector<1x16x64xbf16>
    %32 = vector.shape_cast %31 : vector<1x16x64xbf16> to vector<16x64xbf16>
    %cst_22 = arith.constant dense<0.000000e+00> : vector<8x64xf32>
    %33 = tpu.matmul %30, %32, %cst_22 {dimension_numbers = #tpu.dot_dimension_numbers<[1], [0], [0], [1], [0, 0, 1, 1], [], []>} : vector<8x16xbf16>, vector<16x64xbf16>, vector<8x64xf32> -> vector<8x64xf32>
    %34 = arith.addf %29, %33 : vector<8x64xf32>
    %35 = vector.extract_strided_slice %8 {offsets = [40, 0], sizes = [8, 16], strides = [1, 1]} : vector<392x16xbf16> to vector<8x16xbf16>
    %c5 = arith.constant 5 : index
    %c0_23 = arith.constant 0 : index
    %c0_24 = arith.constant 0 : index
    %36 = vector.load %arg4[%c5, %c0_23, %c0_24] : memref<49x16x64xbf16, #tpu.memory_space<vmem>>, vector<1x16x64xbf16>
    %37 = vector.shape_cast %36 : vector<1x16x64xbf16> to vector<16x64xbf16>
    %cst_25 = arith.constant dense<0.000000e+00> : vector<8x64xf32>
    %38 = tpu.matmul %35, %37, %cst_25 {dimension_numbers = #tpu.dot_dimension_numbers<[1], [0], [0], [1], [0, 0, 1, 1], [], []>} : vector<8x16xbf16>, vector<16x64xbf16>, vector<8x64xf32> -> vector<8x64xf32>
    %39 = arith.addf %34, %38 : vector<8x64xf32>
    %40 = vector.extract_strided_slice %8 {offsets = [48, 0], sizes = [8, 16], strides = [1, 1]} : vector<392x16xbf16> to vector<8x16xbf16>
    %c6 = arith.constant 6 : index
    %c0_26 = arith.constant 0 : index
    %c0_27 = arith.constant 0 : index
    %41 = vector.load %arg4[%c6, %c0_26, %c0_27] : memref<49x16x64xbf16, #tpu.memory_space<vmem>>, vector<1x16x64xbf16>
    %42 = vector.shape_cast %41 : vector<1x16x64xbf16> to vector<16x64xbf16>
    %cst_28 = arith.constant dense<0.000000e+00> : vector<8x64xf32>
    %43 = tpu.matmul %40, %42, %cst_28 {dimension_numbers = #tpu.dot_dimension_numbers<[1], [0], [0], [1], [0, 0, 1, 1], [], []>} : vector<8x16xbf16>, vector<16x64xbf16>, vector<8x64xf32> -> vector<8x64xf32>
    %44 = arith.addf %39, %43 : vector<8x64xf32>
    %45 = vector.extract_strided_slice %8 {offsets = [56, 0], sizes = [8, 16], strides = [1, 1]} : vector<392x16xbf16> to vector<8x16xbf16>
    %c7 = arith.constant 7 : index
    %c0_29 = arith.constant 0 : index
    %c0_30 = arith.constant 0 : index
    %46 = vector.load %arg4[%c7, %c0_29, %c0_30] : memref<49x16x64xbf16, #tpu.memory_space<vmem>>, vector<1x16x64xbf16>
    %47 = vector.shape_cast %46 : vector<1x16x64xbf16> to vector<16x64xbf16>
    %cst_31 = arith.constant dense<0.000000e+00> : vector<8x64xf32>
    %48 = tpu.matmul %45, %47, %cst_31 {dimension_numbers = #tpu.dot_dimension_numbers<[1], [0], [0], [1], [0, 0, 1, 1], [], []>} : vector<8x16xbf16>, vector<16x64xbf16>, vector<8x64xf32> -> vector<8x64xf32>
    %49 = arith.addf %44, %48 : vector<8x64xf32>
    %50 = vector.extract_strided_slice %8 {offsets = [64, 0], sizes = [8, 16], strides = [1, 1]} : vector<392x16xbf16> to vector<8x16xbf16>
    %c8 = arith.constant 8 : index
    %c0_32 = arith.constant 0 : index
    %c0_33 = arith.constant 0 : index
    %51 = vector.load %arg4[%c8, %c0_32, %c0_33] : memref<49x16x64xbf16, #tpu.memory_space<vmem>>, vector<1x16x64xbf16>
    %52 = vector.shape_cast %51 : vector<1x16x64xbf16> to vector<16x64xbf16>
    %cst_34 = arith.constant dense<0.000000e+00> : vector<8x64xf32>
    %53 = tpu.matmul %50, %52, %cst_34 {dimension_numbers = #tpu.dot_dimension_numbers<[1], [0], [0], [1], [0, 0, 1, 1], [], []>} : vector<8x16xbf16>, vector<16x64xbf16>, vector<8x64xf32> -> vector<8x64xf32>
    %54 = arith.addf %49, %53 : vector<8x64xf32>
    %55 = vector.extract_strided_slice %8 {offsets = [72, 0], sizes = [8, 16], strides = [1, 1]} : vector<392x16xbf16> to vector<8x16xbf16>
    %c9 = arith.constant 9 : index
    %c0_35 = arith.constant 0 : index
    %c0_36 = arith.constant 0 : index
    %56 = vector.load %arg4[%c9, %c0_35, %c0_36] : memref<49x16x64xbf16, #tpu.memory_space<vmem>>, vector<1x16x64xbf16>
    %57 = vector.shape_cast %56 : vector<1x16x64xbf16> to vector<16x64xbf16>
    %cst_37 = arith.constant dense<0.000000e+00> : vector<8x64xf32>
    %58 = tpu.matmul %55, %57, %cst_37 {dimension_numbers = #tpu.dot_dimension_numbers<[1], [0], [0], [1], [0, 0, 1, 1], [], []>} : vector<8x16xbf16>, vector<16x64xbf16>, vector<8x64xf32> -> vector<8x64xf32>
    %59 = arith.addf %54, %58 : vector<8x64xf32>
    %60 = vector.extract_strided_slice %8 {offsets = [80, 0], sizes = [8, 16], strides = [1, 1]} : vector<392x16xbf16> to vector<8x16xbf16>
    %c10 = arith.constant 10 : index
    %c0_38 = arith.constant 0 : index
    %c0_39 = arith.constant 0 : index
    %61 = vector.load %arg4[%c10, %c0_38, %c0_39] : memref<49x16x64xbf16, #tpu.memory_space<vmem>>, vector<1x16x64xbf16>
    %62 = vector.shape_cast %61 : vector<1x16x64xbf16> to vector<16x64xbf16>
    %cst_40 = arith.constant dense<0.000000e+00> : vector<8x64xf32>
    %63 = tpu.matmul %60, %62, %cst_40 {dimension_numbers = #tpu.dot_dimension_numbers<[1], [0], [0], [1], [0, 0, 1, 1], [], []>} : vector<8x16xbf16>, vector<16x64xbf16>, vector<8x64xf32> -> vector<8x64xf32>
    %64 = arith.addf %59, %63 : vector<8x64xf32>
    %65 = vector.extract_strided_slice %8 {offsets = [88, 0], sizes = [8, 16], strides = [1, 1]} : vector<392x16xbf16> to vector<8x16xbf16>
    %c11 = arith.constant 11 : index
    %c0_41 = arith.constant 0 : index
    %c0_42 = arith.constant 0 : index
    %66 = vector.load %arg4[%c11, %c0_41, %c0_42] : memref<49x16x64xbf16, #tpu.memory_space<vmem>>, vector<1x16x64xbf16>
    %67 = vector.shape_cast %66 : vector<1x16x64xbf16> to vector<16x64xbf16>
    %cst_43 = arith.constant dense<0.000000e+00> : vector<8x64xf32>
    %68 = tpu.matmul %65, %67, %cst_43 {dimension_numbers = #tpu.dot_dimension_numbers<[1], [0], [0], [1], [0, 0, 1, 1], [], []>} : vector<8x16xbf16>, vector<16x64xbf16>, vector<8x64xf32> -> vector<8x64xf32>
    %69 = arith.addf %64, %68 : vector<8x64xf32>
    %70 = vector.extract_strided_slice %8 {offsets = [96, 0], sizes = [8, 16], strides = [1, 1]} : vector<392x16xbf16> to vector<8x16xbf16>
    %c12 = arith.constant 12 : index
    %c0_44 = arith.constant 0 : index
    %c0_45 = arith.constant 0 : index
    %71 = vector.load %arg4[%c12, %c0_44, %c0_45] : memref<49x16x64xbf16, #tpu.memory_space<vmem>>, vector<1x16x64xbf16>
    %72 = vector.shape_cast %71 : vector<1x16x64xbf16> to vector<16x64xbf16>
    %cst_46 = arith.constant dense<0.000000e+00> : vector<8x64xf32>
    %73 = tpu.matmul %70, %72, %cst_46 {dimension_numbers = #tpu.dot_dimension_numbers<[1], [0], [0], [1], [0, 0, 1, 1], [], []>} : vector<8x16xbf16>, vector<16x64xbf16>, vector<8x64xf32> -> vector<8x64xf32>
    %74 = arith.addf %69, %73 : vector<8x64xf32>
    %75 = vector.extract_strided_slice %8 {offsets = [104, 0], sizes = [8, 16], strides = [1, 1]} : vector<392x16xbf16> to vector<8x16xbf16>
    %c13 = arith.constant 13 : index
    %c0_47 = arith.constant 0 : index
    %c0_48 = arith.constant 0 : index
    %76 = vector.load %arg4[%c13, %c0_47, %c0_48] : memref<49x16x64xbf16, #tpu.memory_space<vmem>>, vector<1x16x64xbf16>
    %77 = vector.shape_cast %76 : vector<1x16x64xbf16> to vector<16x64xbf16>
    %cst_49 = arith.constant dense<0.000000e+00> : vector<8x64xf32>
    %78 = tpu.matmul %75, %77, %cst_49 {dimension_numbers = #tpu.dot_dimension_numbers<[1], [0], [0], [1], [0, 0, 1, 1], [], []>} : vector<8x16xbf16>, vector<16x64xbf16>, vector<8x64xf32> -> vector<8x64xf32>
    %79 = arith.addf %74, %78 : vector<8x64xf32>
    %80 = vector.extract_strided_slice %8 {offsets = [112, 0], sizes = [8, 16], strides = [1, 1]} : vector<392x16xbf16> to vector<8x16xbf16>
    %c14 = arith.constant 14 : index
    %c0_50 = arith.constant 0 : index
    %c0_51 = arith.constant 0 : index
    %81 = vector.load %arg4[%c14, %c0_50, %c0_51] : memref<49x16x64xbf16, #tpu.memory_space<vmem>>, vector<1x16x64xbf16>
    %82 = vector.shape_cast %81 : vector<1x16x64xbf16> to vector<16x64xbf16>
    %cst_52 = arith.constant dense<0.000000e+00> : vector<8x64xf32>
    %83 = tpu.matmul %80, %82, %cst_52 {dimension_numbers = #tpu.dot_dimension_numbers<[1], [0], [0], [1], [0, 0, 1, 1], [], []>} : vector<8x16xbf16>, vector<16x64xbf16>, vector<8x64xf32> -> vector<8x64xf32>
    %84 = arith.addf %79, %83 : vector<8x64xf32>
    %85 = vector.extract_strided_slice %8 {offsets = [120, 0], sizes = [8, 16], strides = [1, 1]} : vector<392x16xbf16> to vector<8x16xbf16>
    %c15 = arith.constant 15 : index
    %c0_53 = arith.constant 0 : index
    %c0_54 = arith.constant 0 : index
    %86 = vector.load %arg4[%c15, %c0_53, %c0_54] : memref<49x16x64xbf16, #tpu.memory_space<vmem>>, vector<1x16x64xbf16>
    %87 = vector.shape_cast %86 : vector<1x16x64xbf16> to vector<16x64xbf16>
    %cst_55 = arith.constant dense<0.000000e+00> : vector<8x64xf32>
    %88 = tpu.matmul %85, %87, %cst_55 {dimension_numbers = #tpu.dot_dimension_numbers<[1], [0], [0], [1], [0, 0, 1, 1], [], []>} : vector<8x16xbf16>, vector<16x64xbf16>, vector<8x64xf32> -> vector<8x64xf32>
    %89 = arith.addf %84, %88 : vector<8x64xf32>
    %90 = vector.extract_strided_slice %8 {offsets = [128, 0], sizes = [8, 16], strides = [1, 1]} : vector<392x16xbf16> to vector<8x16xbf16>
    %c16 = arith.constant 16 : index
    %c0_56 = arith.constant 0 : index
    %c0_57 = arith.constant 0 : index
    %91 = vector.load %arg4[%c16, %c0_56, %c0_57] : memref<49x16x64xbf16, #tpu.memory_space<vmem>>, vector<1x16x64xbf16>
    %92 = vector.shape_cast %91 : vector<1x16x64xbf16> to vector<16x64xbf16>
    %cst_58 = arith.constant dense<0.000000e+00> : vector<8x64xf32>
    %93 = tpu.matmul %90, %92, %cst_58 {dimension_numbers = #tpu.dot_dimension_numbers<[1], [0], [0], [1], [0, 0, 1, 1], [], []>} : vector<8x16xbf16>, vector<16x64xbf16>, vector<8x64xf32> -> vector<8x64xf32>
    %94 = arith.addf %89, %93 : vector<8x64xf32>
    %95 = vector.extract_strided_slice %8 {offsets = [136, 0], sizes = [8, 16], strides = [1, 1]} : vector<392x16xbf16> to vector<8x16xbf16>
    %c17 = arith.constant 17 : index
    %c0_59 = arith.constant 0 : index
    %c0_60 = arith.constant 0 : index
    %96 = vector.load %arg4[%c17, %c0_59, %c0_60] : memref<49x16x64xbf16, #tpu.memory_space<vmem>>, vector<1x16x64xbf16>
    %97 = vector.shape_cast %96 : vector<1x16x64xbf16> to vector<16x64xbf16>
    %cst_61 = arith.constant dense<0.000000e+00> : vector<8x64xf32>
    %98 = tpu.matmul %95, %97, %cst_61 {dimension_numbers = #tpu.dot_dimension_numbers<[1], [0], [0], [1], [0, 0, 1, 1], [], []>} : vector<8x16xbf16>, vector<16x64xbf16>, vector<8x64xf32> -> vector<8x64xf32>
    %99 = arith.addf %94, %98 : vector<8x64xf32>
    %100 = vector.extract_strided_slice %8 {offsets = [144, 0], sizes = [8, 16], strides = [1, 1]} : vector<392x16xbf16> to vector<8x16xbf16>
    %c18 = arith.constant 18 : index
    %c0_62 = arith.constant 0 : index
    %c0_63 = arith.constant 0 : index
    %101 = vector.load %arg4[%c18, %c0_62, %c0_63] : memref<49x16x64xbf16, #tpu.memory_space<vmem>>, vector<1x16x64xbf16>
    %102 = vector.shape_cast %101 : vector<1x16x64xbf16> to vector<16x64xbf16>
    %cst_64 = arith.constant dense<0.000000e+00> : vector<8x64xf32>
    %103 = tpu.matmul %100, %102, %cst_64 {dimension_numbers = #tpu.dot_dimension_numbers<[1], [0], [0], [1], [0, 0, 1, 1], [], []>} : vector<8x16xbf16>, vector<16x64xbf16>, vector<8x64xf32> -> vector<8x64xf32>
    %104 = arith.addf %99, %103 : vector<8x64xf32>
    %105 = vector.extract_strided_slice %8 {offsets = [152, 0], sizes = [8, 16], strides = [1, 1]} : vector<392x16xbf16> to vector<8x16xbf16>
    %c19 = arith.constant 19 : index
    %c0_65 = arith.constant 0 : index
    %c0_66 = arith.constant 0 : index
    %106 = vector.load %arg4[%c19, %c0_65, %c0_66] : memref<49x16x64xbf16, #tpu.memory_space<vmem>>, vector<1x16x64xbf16>
    %107 = vector.shape_cast %106 : vector<1x16x64xbf16> to vector<16x64xbf16>
    %cst_67 = arith.constant dense<0.000000e+00> : vector<8x64xf32>
    %108 = tpu.matmul %105, %107, %cst_67 {dimension_numbers = #tpu.dot_dimension_numbers<[1], [0], [0], [1], [0, 0, 1, 1], [], []>} : vector<8x16xbf16>, vector<16x64xbf16>, vector<8x64xf32> -> vector<8x64xf32>
    %109 = arith.addf %104, %108 : vector<8x64xf32>
    %110 = vector.extract_strided_slice %8 {offsets = [160, 0], sizes = [8, 16], strides = [1, 1]} : vector<392x16xbf16> to vector<8x16xbf16>
    %c20 = arith.constant 20 : index
    %c0_68 = arith.constant 0 : index
    %c0_69 = arith.constant 0 : index
    %111 = vector.load %arg4[%c20, %c0_68, %c0_69] : memref<49x16x64xbf16, #tpu.memory_space<vmem>>, vector<1x16x64xbf16>
    %112 = vector.shape_cast %111 : vector<1x16x64xbf16> to vector<16x64xbf16>
    %cst_70 = arith.constant dense<0.000000e+00> : vector<8x64xf32>
    %113 = tpu.matmul %110, %112, %cst_70 {dimension_numbers = #tpu.dot_dimension_numbers<[1], [0], [0], [1], [0, 0, 1, 1], [], []>} : vector<8x16xbf16>, vector<16x64xbf16>, vector<8x64xf32> -> vector<8x64xf32>
    %114 = arith.addf %109, %113 : vector<8x64xf32>
    %115 = vector.extract_strided_slice %8 {offsets = [168, 0], sizes = [8, 16], strides = [1, 1]} : vector<392x16xbf16> to vector<8x16xbf16>
    %c21 = arith.constant 21 : index
    %c0_71 = arith.constant 0 : index
    %c0_72 = arith.constant 0 : index
    %116 = vector.load %arg4[%c21, %c0_71, %c0_72] : memref<49x16x64xbf16, #tpu.memory_space<vmem>>, vector<1x16x64xbf16>
    %117 = vector.shape_cast %116 : vector<1x16x64xbf16> to vector<16x64xbf16>
    %cst_73 = arith.constant dense<0.000000e+00> : vector<8x64xf32>
    %118 = tpu.matmul %115, %117, %cst_73 {dimension_numbers = #tpu.dot_dimension_numbers<[1], [0], [0], [1], [0, 0, 1, 1], [], []>} : vector<8x16xbf16>, vector<16x64xbf16>, vector<8x64xf32> -> vector<8x64xf32>
    %119 = arith.addf %114, %118 : vector<8x64xf32>
    %120 = vector.extract_strided_slice %8 {offsets = [176, 0], sizes = [8, 16], strides = [1, 1]} : vector<392x16xbf16> to vector<8x16xbf16>
    %c22 = arith.constant 22 : index
    %c0_74 = arith.constant 0 : index
    %c0_75 = arith.constant 0 : index
    %121 = vector.load %arg4[%c22, %c0_74, %c0_75] : memref<49x16x64xbf16, #tpu.memory_space<vmem>>, vector<1x16x64xbf16>
    %122 = vector.shape_cast %121 : vector<1x16x64xbf16> to vector<16x64xbf16>
    %cst_76 = arith.constant dense<0.000000e+00> : vector<8x64xf32>
    %123 = tpu.matmul %120, %122, %cst_76 {dimension_numbers = #tpu.dot_dimension_numbers<[1], [0], [0], [1], [0, 0, 1, 1], [], []>} : vector<8x16xbf16>, vector<16x64xbf16>, vector<8x64xf32> -> vector<8x64xf32>
    %124 = arith.addf %119, %123 : vector<8x64xf32>
    %125 = vector.extract_strided_slice %8 {offsets = [184, 0], sizes = [8, 16], strides = [1, 1]} : vector<392x16xbf16> to vector<8x16xbf16>
    %c23 = arith.constant 23 : index
    %c0_77 = arith.constant 0 : index
    %c0_78 = arith.constant 0 : index
    %126 = vector.load %arg4[%c23, %c0_77, %c0_78] : memref<49x16x64xbf16, #tpu.memory_space<vmem>>, vector<1x16x64xbf16>
    %127 = vector.shape_cast %126 : vector<1x16x64xbf16> to vector<16x64xbf16>
    %cst_79 = arith.constant dense<0.000000e+00> : vector<8x64xf32>
    %128 = tpu.matmul %125, %127, %cst_79 {dimension_numbers = #tpu.dot_dimension_numbers<[1], [0], [0], [1], [0, 0, 1, 1], [], []>} : vector<8x16xbf16>, vector<16x64xbf16>, vector<8x64xf32> -> vector<8x64xf32>
    %129 = arith.addf %124, %128 : vector<8x64xf32>
    %130 = vector.extract_strided_slice %8 {offsets = [192, 0], sizes = [8, 16], strides = [1, 1]} : vector<392x16xbf16> to vector<8x16xbf16>
    %c24 = arith.constant 24 : index
    %c0_80 = arith.constant 0 : index
    %c0_81 = arith.constant 0 : index
    %131 = vector.load %arg4[%c24, %c0_80, %c0_81] : memref<49x16x64xbf16, #tpu.memory_space<vmem>>, vector<1x16x64xbf16>
    %132 = vector.shape_cast %131 : vector<1x16x64xbf16> to vector<16x64xbf16>
    %cst_82 = arith.constant dense<0.000000e+00> : vector<8x64xf32>
    %133 = tpu.matmul %130, %132, %cst_82 {dimension_numbers = #tpu.dot_dimension_numbers<[1], [0], [0], [1], [0, 0, 1, 1], [], []>} : vector<8x16xbf16>, vector<16x64xbf16>, vector<8x64xf32> -> vector<8x64xf32>
    %134 = arith.addf %129, %133 : vector<8x64xf32>
    %135 = vector.extract_strided_slice %8 {offsets = [200, 0], sizes = [8, 16], strides = [1, 1]} : vector<392x16xbf16> to vector<8x16xbf16>
    %c25 = arith.constant 25 : index
    %c0_83 = arith.constant 0 : index
    %c0_84 = arith.constant 0 : index
    %136 = vector.load %arg4[%c25, %c0_83, %c0_84] : memref<49x16x64xbf16, #tpu.memory_space<vmem>>, vector<1x16x64xbf16>
    %137 = vector.shape_cast %136 : vector<1x16x64xbf16> to vector<16x64xbf16>
    %cst_85 = arith.constant dense<0.000000e+00> : vector<8x64xf32>
    %138 = tpu.matmul %135, %137, %cst_85 {dimension_numbers = #tpu.dot_dimension_numbers<[1], [0], [0], [1], [0, 0, 1, 1], [], []>} : vector<8x16xbf16>, vector<16x64xbf16>, vector<8x64xf32> -> vector<8x64xf32>
    %139 = arith.addf %134, %138 : vector<8x64xf32>
    %140 = vector.extract_strided_slice %8 {offsets = [208, 0], sizes = [8, 16], strides = [1, 1]} : vector<392x16xbf16> to vector<8x16xbf16>
    %c26 = arith.constant 26 : index
    %c0_86 = arith.constant 0 : index
    %c0_87 = arith.constant 0 : index
    %141 = vector.load %arg4[%c26, %c0_86, %c0_87] : memref<49x16x64xbf16, #tpu.memory_space<vmem>>, vector<1x16x64xbf16>
    %142 = vector.shape_cast %141 : vector<1x16x64xbf16> to vector<16x64xbf16>
    %cst_88 = arith.constant dense<0.000000e+00> : vector<8x64xf32>
    %143 = tpu.matmul %140, %142, %cst_88 {dimension_numbers = #tpu.dot_dimension_numbers<[1], [0], [0], [1], [0, 0, 1, 1], [], []>} : vector<8x16xbf16>, vector<16x64xbf16>, vector<8x64xf32> -> vector<8x64xf32>
    %144 = arith.addf %139, %143 : vector<8x64xf32>
    %145 = vector.extract_strided_slice %8 {offsets = [216, 0], sizes = [8, 16], strides = [1, 1]} : vector<392x16xbf16> to vector<8x16xbf16>
    %c27 = arith.constant 27 : index
    %c0_89 = arith.constant 0 : index
    %c0_90 = arith.constant 0 : index
    %146 = vector.load %arg4[%c27, %c0_89, %c0_90] : memref<49x16x64xbf16, #tpu.memory_space<vmem>>, vector<1x16x64xbf16>
    %147 = vector.shape_cast %146 : vector<1x16x64xbf16> to vector<16x64xbf16>
    %cst_91 = arith.constant dense<0.000000e+00> : vector<8x64xf32>
    %148 = tpu.matmul %145, %147, %cst_91 {dimension_numbers = #tpu.dot_dimension_numbers<[1], [0], [0], [1], [0, 0, 1, 1], [], []>} : vector<8x16xbf16>, vector<16x64xbf16>, vector<8x64xf32> -> vector<8x64xf32>
    %149 = arith.addf %144, %148 : vector<8x64xf32>
    %150 = vector.extract_strided_slice %8 {offsets = [224, 0], sizes = [8, 16], strides = [1, 1]} : vector<392x16xbf16> to vector<8x16xbf16>
    %c28 = arith.constant 28 : index
    %c0_92 = arith.constant 0 : index
    %c0_93 = arith.constant 0 : index
    %151 = vector.load %arg4[%c28, %c0_92, %c0_93] : memref<49x16x64xbf16, #tpu.memory_space<vmem>>, vector<1x16x64xbf16>
    %152 = vector.shape_cast %151 : vector<1x16x64xbf16> to vector<16x64xbf16>
    %cst_94 = arith.constant dense<0.000000e+00> : vector<8x64xf32>
    %153 = tpu.matmul %150, %152, %cst_94 {dimension_numbers = #tpu.dot_dimension_numbers<[1], [0], [0], [1], [0, 0, 1, 1], [], []>} : vector<8x16xbf16>, vector<16x64xbf16>, vector<8x64xf32> -> vector<8x64xf32>
    %154 = arith.addf %149, %153 : vector<8x64xf32>
    %155 = vector.extract_strided_slice %8 {offsets = [232, 0], sizes = [8, 16], strides = [1, 1]} : vector<392x16xbf16> to vector<8x16xbf16>
    %c29 = arith.constant 29 : index
    %c0_95 = arith.constant 0 : index
    %c0_96 = arith.constant 0 : index
    %156 = vector.load %arg4[%c29, %c0_95, %c0_96] : memref<49x16x64xbf16, #tpu.memory_space<vmem>>, vector<1x16x64xbf16>
    %157 = vector.shape_cast %156 : vector<1x16x64xbf16> to vector<16x64xbf16>
    %cst_97 = arith.constant dense<0.000000e+00> : vector<8x64xf32>
    %158 = tpu.matmul %155, %157, %cst_97 {dimension_numbers = #tpu.dot_dimension_numbers<[1], [0], [0], [1], [0, 0, 1, 1], [], []>} : vector<8x16xbf16>, vector<16x64xbf16>, vector<8x64xf32> -> vector<8x64xf32>
    %159 = arith.addf %154, %158 : vector<8x64xf32>
    %160 = vector.extract_strided_slice %8 {offsets = [240, 0], sizes = [8, 16], strides = [1, 1]} : vector<392x16xbf16> to vector<8x16xbf16>
    %c30 = arith.constant 30 : index
    %c0_98 = arith.constant 0 : index
    %c0_99 = arith.constant 0 : index
    %161 = vector.load %arg4[%c30, %c0_98, %c0_99] : memref<49x16x64xbf16, #tpu.memory_space<vmem>>, vector<1x16x64xbf16>
    %162 = vector.shape_cast %161 : vector<1x16x64xbf16> to vector<16x64xbf16>
    %cst_100 = arith.constant dense<0.000000e+00> : vector<8x64xf32>
    %163 = tpu.matmul %160, %162, %cst_100 {dimension_numbers = #tpu.dot_dimension_numbers<[1], [0], [0], [1], [0, 0, 1, 1], [], []>} : vector<8x16xbf16>, vector<16x64xbf16>, vector<8x64xf32> -> vector<8x64xf32>
    %164 = arith.addf %159, %163 : vector<8x64xf32>
    %165 = vector.extract_strided_slice %8 {offsets = [248, 0], sizes = [8, 16], strides = [1, 1]} : vector<392x16xbf16> to vector<8x16xbf16>
    %c31 = arith.constant 31 : index
    %c0_101 = arith.constant 0 : index
    %c0_102 = arith.constant 0 : index
    %166 = vector.load %arg4[%c31, %c0_101, %c0_102] : memref<49x16x64xbf16, #tpu.memory_space<vmem>>, vector<1x16x64xbf16>
    %167 = vector.shape_cast %166 : vector<1x16x64xbf16> to vector<16x64xbf16>
    %cst_103 = arith.constant dense<0.000000e+00> : vector<8x64xf32>
    %168 = tpu.matmul %165, %167, %cst_103 {dimension_numbers = #tpu.dot_dimension_numbers<[1], [0], [0], [1], [0, 0, 1, 1], [], []>} : vector<8x16xbf16>, vector<16x64xbf16>, vector<8x64xf32> -> vector<8x64xf32>
    %169 = arith.addf %164, %168 : vector<8x64xf32>
    %170 = vector.extract_strided_slice %8 {offsets = [256, 0], sizes = [8, 16], strides = [1, 1]} : vector<392x16xbf16> to vector<8x16xbf16>
    %c32 = arith.constant 32 : index
    %c0_104 = arith.constant 0 : index
    %c0_105 = arith.constant 0 : index
    %171 = vector.load %arg4[%c32, %c0_104, %c0_105] : memref<49x16x64xbf16, #tpu.memory_space<vmem>>, vector<1x16x64xbf16>
    %172 = vector.shape_cast %171 : vector<1x16x64xbf16> to vector<16x64xbf16>
    %cst_106 = arith.constant dense<0.000000e+00> : vector<8x64xf32>
    %173 = tpu.matmul %170, %172, %cst_106 {dimension_numbers = #tpu.dot_dimension_numbers<[1], [0], [0], [1], [0, 0, 1, 1], [], []>} : vector<8x16xbf16>, vector<16x64xbf16>, vector<8x64xf32> -> vector<8x64xf32>
    %174 = arith.addf %169, %173 : vector<8x64xf32>
    %175 = vector.extract_strided_slice %8 {offsets = [264, 0], sizes = [8, 16], strides = [1, 1]} : vector<392x16xbf16> to vector<8x16xbf16>
    %c33 = arith.constant 33 : index
    %c0_107 = arith.constant 0 : index
    %c0_108 = arith.constant 0 : index
    %176 = vector.load %arg4[%c33, %c0_107, %c0_108] : memref<49x16x64xbf16, #tpu.memory_space<vmem>>, vector<1x16x64xbf16>
    %177 = vector.shape_cast %176 : vector<1x16x64xbf16> to vector<16x64xbf16>
    %cst_109 = arith.constant dense<0.000000e+00> : vector<8x64xf32>
    %178 = tpu.matmul %175, %177, %cst_109 {dimension_numbers = #tpu.dot_dimension_numbers<[1], [0], [0], [1], [0, 0, 1, 1], [], []>} : vector<8x16xbf16>, vector<16x64xbf16>, vector<8x64xf32> -> vector<8x64xf32>
    %179 = arith.addf %174, %178 : vector<8x64xf32>
    %180 = vector.extract_strided_slice %8 {offsets = [272, 0], sizes = [8, 16], strides = [1, 1]} : vector<392x16xbf16> to vector<8x16xbf16>
    %c34 = arith.constant 34 : index
    %c0_110 = arith.constant 0 : index
    %c0_111 = arith.constant 0 : index
    %181 = vector.load %arg4[%c34, %c0_110, %c0_111] : memref<49x16x64xbf16, #tpu.memory_space<vmem>>, vector<1x16x64xbf16>
    %182 = vector.shape_cast %181 : vector<1x16x64xbf16> to vector<16x64xbf16>
    %cst_112 = arith.constant dense<0.000000e+00> : vector<8x64xf32>
    %183 = tpu.matmul %180, %182, %cst_112 {dimension_numbers = #tpu.dot_dimension_numbers<[1], [0], [0], [1], [0, 0, 1, 1], [], []>} : vector<8x16xbf16>, vector<16x64xbf16>, vector<8x64xf32> -> vector<8x64xf32>
    %184 = arith.addf %179, %183 : vector<8x64xf32>
    %185 = vector.extract_strided_slice %8 {offsets = [280, 0], sizes = [8, 16], strides = [1, 1]} : vector<392x16xbf16> to vector<8x16xbf16>
    %c35 = arith.constant 35 : index
    %c0_113 = arith.constant 0 : index
    %c0_114 = arith.constant 0 : index
    %186 = vector.load %arg4[%c35, %c0_113, %c0_114] : memref<49x16x64xbf16, #tpu.memory_space<vmem>>, vector<1x16x64xbf16>
    %187 = vector.shape_cast %186 : vector<1x16x64xbf16> to vector<16x64xbf16>
    %cst_115 = arith.constant dense<0.000000e+00> : vector<8x64xf32>
    %188 = tpu.matmul %185, %187, %cst_115 {dimension_numbers = #tpu.dot_dimension_numbers<[1], [0], [0], [1], [0, 0, 1, 1], [], []>} : vector<8x16xbf16>, vector<16x64xbf16>, vector<8x64xf32> -> vector<8x64xf32>
    %189 = arith.addf %184, %188 : vector<8x64xf32>
    %190 = vector.extract_strided_slice %8 {offsets = [288, 0], sizes = [8, 16], strides = [1, 1]} : vector<392x16xbf16> to vector<8x16xbf16>
    %c36 = arith.constant 36 : index
    %c0_116 = arith.constant 0 : index
    %c0_117 = arith.constant 0 : index
    %191 = vector.load %arg4[%c36, %c0_116, %c0_117] : memref<49x16x64xbf16, #tpu.memory_space<vmem>>, vector<1x16x64xbf16>
    %192 = vector.shape_cast %191 : vector<1x16x64xbf16> to vector<16x64xbf16>
    %cst_118 = arith.constant dense<0.000000e+00> : vector<8x64xf32>
    %193 = tpu.matmul %190, %192, %cst_118 {dimension_numbers = #tpu.dot_dimension_numbers<[1], [0], [0], [1], [0, 0, 1, 1], [], []>} : vector<8x16xbf16>, vector<16x64xbf16>, vector<8x64xf32> -> vector<8x64xf32>
    %194 = arith.addf %189, %193 : vector<8x64xf32>
    %195 = vector.extract_strided_slice %8 {offsets = [296, 0], sizes = [8, 16], strides = [1, 1]} : vector<392x16xbf16> to vector<8x16xbf16>
    %c37 = arith.constant 37 : index
    %c0_119 = arith.constant 0 : index
    %c0_120 = arith.constant 0 : index
    %196 = vector.load %arg4[%c37, %c0_119, %c0_120] : memref<49x16x64xbf16, #tpu.memory_space<vmem>>, vector<1x16x64xbf16>
    %197 = vector.shape_cast %196 : vector<1x16x64xbf16> to vector<16x64xbf16>
    %cst_121 = arith.constant dense<0.000000e+00> : vector<8x64xf32>
    %198 = tpu.matmul %195, %197, %cst_121 {dimension_numbers = #tpu.dot_dimension_numbers<[1], [0], [0], [1], [0, 0, 1, 1], [], []>} : vector<8x16xbf16>, vector<16x64xbf16>, vector<8x64xf32> -> vector<8x64xf32>
    %199 = arith.addf %194, %198 : vector<8x64xf32>
    %200 = vector.extract_strided_slice %8 {offsets = [304, 0], sizes = [8, 16], strides = [1, 1]} : vector<392x16xbf16> to vector<8x16xbf16>
    %c38 = arith.constant 38 : index
    %c0_122 = arith.constant 0 : index
    %c0_123 = arith.constant 0 : index
    %201 = vector.load %arg4[%c38, %c0_122, %c0_123] : memref<49x16x64xbf16, #tpu.memory_space<vmem>>, vector<1x16x64xbf16>
    %202 = vector.shape_cast %201 : vector<1x16x64xbf16> to vector<16x64xbf16>
    %cst_124 = arith.constant dense<0.000000e+00> : vector<8x64xf32>
    %203 = tpu.matmul %200, %202, %cst_124 {dimension_numbers = #tpu.dot_dimension_numbers<[1], [0], [0], [1], [0, 0, 1, 1], [], []>} : vector<8x16xbf16>, vector<16x64xbf16>, vector<8x64xf32> -> vector<8x64xf32>
    %204 = arith.addf %199, %203 : vector<8x64xf32>
    %205 = vector.extract_strided_slice %8 {offsets = [312, 0], sizes = [8, 16], strides = [1, 1]} : vector<392x16xbf16> to vector<8x16xbf16>
    %c39 = arith.constant 39 : index
    %c0_125 = arith.constant 0 : index
    %c0_126 = arith.constant 0 : index
    %206 = vector.load %arg4[%c39, %c0_125, %c0_126] : memref<49x16x64xbf16, #tpu.memory_space<vmem>>, vector<1x16x64xbf16>
    %207 = vector.shape_cast %206 : vector<1x16x64xbf16> to vector<16x64xbf16>
    %cst_127 = arith.constant dense<0.000000e+00> : vector<8x64xf32>
    %208 = tpu.matmul %205, %207, %cst_127 {dimension_numbers = #tpu.dot_dimension_numbers<[1], [0], [0], [1], [0, 0, 1, 1], [], []>} : vector<8x16xbf16>, vector<16x64xbf16>, vector<8x64xf32> -> vector<8x64xf32>
    %209 = arith.addf %204, %208 : vector<8x64xf32>
    %210 = vector.extract_strided_slice %8 {offsets = [320, 0], sizes = [8, 16], strides = [1, 1]} : vector<392x16xbf16> to vector<8x16xbf16>
    %c40 = arith.constant 40 : index
    %c0_128 = arith.constant 0 : index
    %c0_129 = arith.constant 0 : index
    %211 = vector.load %arg4[%c40, %c0_128, %c0_129] : memref<49x16x64xbf16, #tpu.memory_space<vmem>>, vector<1x16x64xbf16>
    %212 = vector.shape_cast %211 : vector<1x16x64xbf16> to vector<16x64xbf16>
    %cst_130 = arith.constant dense<0.000000e+00> : vector<8x64xf32>
    %213 = tpu.matmul %210, %212, %cst_130 {dimension_numbers = #tpu.dot_dimension_numbers<[1], [0], [0], [1], [0, 0, 1, 1], [], []>} : vector<8x16xbf16>, vector<16x64xbf16>, vector<8x64xf32> -> vector<8x64xf32>
    %214 = arith.addf %209, %213 : vector<8x64xf32>
    %215 = vector.extract_strided_slice %8 {offsets = [328, 0], sizes = [8, 16], strides = [1, 1]} : vector<392x16xbf16> to vector<8x16xbf16>
    %c41 = arith.constant 41 : index
    %c0_131 = arith.constant 0 : index
    %c0_132 = arith.constant 0 : index
    %216 = vector.load %arg4[%c41, %c0_131, %c0_132] : memref<49x16x64xbf16, #tpu.memory_space<vmem>>, vector<1x16x64xbf16>
    %217 = vector.shape_cast %216 : vector<1x16x64xbf16> to vector<16x64xbf16>
    %cst_133 = arith.constant dense<0.000000e+00> : vector<8x64xf32>
    %218 = tpu.matmul %215, %217, %cst_133 {dimension_numbers = #tpu.dot_dimension_numbers<[1], [0], [0], [1], [0, 0, 1, 1], [], []>} : vector<8x16xbf16>, vector<16x64xbf16>, vector<8x64xf32> -> vector<8x64xf32>
    %219 = arith.addf %214, %218 : vector<8x64xf32>
    %220 = vector.extract_strided_slice %8 {offsets = [336, 0], sizes = [8, 16], strides = [1, 1]} : vector<392x16xbf16> to vector<8x16xbf16>
    %c42 = arith.constant 42 : index
    %c0_134 = arith.constant 0 : index
    %c0_135 = arith.constant 0 : index
    %221 = vector.load %arg4[%c42, %c0_134, %c0_135] : memref<49x16x64xbf16, #tpu.memory_space<vmem>>, vector<1x16x64xbf16>
    %222 = vector.shape_cast %221 : vector<1x16x64xbf16> to vector<16x64xbf16>
    %cst_136 = arith.constant dense<0.000000e+00> : vector<8x64xf32>
    %223 = tpu.matmul %220, %222, %cst_136 {dimension_numbers = #tpu.dot_dimension_numbers<[1], [0], [0], [1], [0, 0, 1, 1], [], []>} : vector<8x16xbf16>, vector<16x64xbf16>, vector<8x64xf32> -> vector<8x64xf32>
    %224 = arith.addf %219, %223 : vector<8x64xf32>
    %225 = vector.extract_strided_slice %8 {offsets = [344, 0], sizes = [8, 16], strides = [1, 1]} : vector<392x16xbf16> to vector<8x16xbf16>
    %c43 = arith.constant 43 : index
    %c0_137 = arith.constant 0 : index
    %c0_138 = arith.constant 0 : index
    %226 = vector.load %arg4[%c43, %c0_137, %c0_138] : memref<49x16x64xbf16, #tpu.memory_space<vmem>>, vector<1x16x64xbf16>
    %227 = vector.shape_cast %226 : vector<1x16x64xbf16> to vector<16x64xbf16>
    %cst_139 = arith.constant dense<0.000000e+00> : vector<8x64xf32>
    %228 = tpu.matmul %225, %227, %cst_139 {dimension_numbers = #tpu.dot_dimension_numbers<[1], [0], [0], [1], [0, 0, 1, 1], [], []>} : vector<8x16xbf16>, vector<16x64xbf16>, vector<8x64xf32> -> vector<8x64xf32>
    %229 = arith.addf %224, %228 : vector<8x64xf32>
    %230 = vector.extract_strided_slice %8 {offsets = [352, 0], sizes = [8, 16], strides = [1, 1]} : vector<392x16xbf16> to vector<8x16xbf16>
    %c44 = arith.constant 44 : index
    %c0_140 = arith.constant 0 : index
    %c0_141 = arith.constant 0 : index
    %231 = vector.load %arg4[%c44, %c0_140, %c0_141] : memref<49x16x64xbf16, #tpu.memory_space<vmem>>, vector<1x16x64xbf16>
    %232 = vector.shape_cast %231 : vector<1x16x64xbf16> to vector<16x64xbf16>
    %cst_142 = arith.constant dense<0.000000e+00> : vector<8x64xf32>
    %233 = tpu.matmul %230, %232, %cst_142 {dimension_numbers = #tpu.dot_dimension_numbers<[1], [0], [0], [1], [0, 0, 1, 1], [], []>} : vector<8x16xbf16>, vector<16x64xbf16>, vector<8x64xf32> -> vector<8x64xf32>
    %234 = arith.addf %229, %233 : vector<8x64xf32>
    %235 = vector.extract_strided_slice %8 {offsets = [360, 0], sizes = [8, 16], strides = [1, 1]} : vector<392x16xbf16> to vector<8x16xbf16>
    %c45 = arith.constant 45 : index
    %c0_143 = arith.constant 0 : index
    %c0_144 = arith.constant 0 : index
    %236 = vector.load %arg4[%c45, %c0_143, %c0_144] : memref<49x16x64xbf16, #tpu.memory_space<vmem>>, vector<1x16x64xbf16>
    %237 = vector.shape_cast %236 : vector<1x16x64xbf16> to vector<16x64xbf16>
    %cst_145 = arith.constant dense<0.000000e+00> : vector<8x64xf32>
    %238 = tpu.matmul %235, %237, %cst_145 {dimension_numbers = #tpu.dot_dimension_numbers<[1], [0], [0], [1], [0, 0, 1, 1], [], []>} : vector<8x16xbf16>, vector<16x64xbf16>, vector<8x64xf32> -> vector<8x64xf32>
    %239 = arith.addf %234, %238 : vector<8x64xf32>
    %240 = vector.extract_strided_slice %8 {offsets = [368, 0], sizes = [8, 16], strides = [1, 1]} : vector<392x16xbf16> to vector<8x16xbf16>
    %c46 = arith.constant 46 : index
    %c0_146 = arith.constant 0 : index
    %c0_147 = arith.constant 0 : index
    %241 = vector.load %arg4[%c46, %c0_146, %c0_147] : memref<49x16x64xbf16, #tpu.memory_space<vmem>>, vector<1x16x64xbf16>
    %242 = vector.shape_cast %241 : vector<1x16x64xbf16> to vector<16x64xbf16>
    %cst_148 = arith.constant dense<0.000000e+00> : vector<8x64xf32>
    %243 = tpu.matmul %240, %242, %cst_148 {dimension_numbers = #tpu.dot_dimension_numbers<[1], [0], [0], [1], [0, 0, 1, 1], [], []>} : vector<8x16xbf16>, vector<16x64xbf16>, vector<8x64xf32> -> vector<8x64xf32>
    %244 = arith.addf %239, %243 : vector<8x64xf32>
    %245 = vector.extract_strided_slice %8 {offsets = [376, 0], sizes = [8, 16], strides = [1, 1]} : vector<392x16xbf16> to vector<8x16xbf16>
    %c47 = arith.constant 47 : index
    %c0_149 = arith.constant 0 : index
    %c0_150 = arith.constant 0 : index
    %246 = vector.load %arg4[%c47, %c0_149, %c0_150] : memref<49x16x64xbf16, #tpu.memory_space<vmem>>, vector<1x16x64xbf16>
    %247 = vector.shape_cast %246 : vector<1x16x64xbf16> to vector<16x64xbf16>
    %cst_151 = arith.constant dense<0.000000e+00> : vector<8x64xf32>
    %248 = tpu.matmul %245, %247, %cst_151 {dimension_numbers = #tpu.dot_dimension_numbers<[1], [0], [0], [1], [0, 0, 1, 1], [], []>} : vector<8x16xbf16>, vector<16x64xbf16>, vector<8x64xf32> -> vector<8x64xf32>
    %249 = arith.addf %244, %248 : vector<8x64xf32>
    %250 = vector.extract_strided_slice %8 {offsets = [384, 0], sizes = [8, 16], strides = [1, 1]} : vector<392x16xbf16> to vector<8x16xbf16>
    %c48 = arith.constant 48 : index
    %c0_152 = arith.constant 0 : index
    %c0_153 = arith.constant 0 : index
    %251 = vector.load %arg4[%c48, %c0_152, %c0_153] : memref<49x16x64xbf16, #tpu.memory_space<vmem>>, vector<1x16x64xbf16>
    %252 = vector.shape_cast %251 : vector<1x16x64xbf16> to vector<16x64xbf16>
    %cst_154 = arith.constant dense<0.000000e+00> : vector<8x64xf32>
    %253 = tpu.matmul %250, %252, %cst_154 {dimension_numbers = #tpu.dot_dimension_numbers<[1], [0], [0], [1], [0, 0, 1, 1], [], []>} : vector<8x16xbf16>, vector<16x64xbf16>, vector<8x64xf32> -> vector<8x64xf32>
    %254 = arith.addf %249, %253 : vector<8x64xf32>
    %c0_155 = arith.constant 0 : index
    %c0_156 = arith.constant 0 : index
    %255 = vector.load %arg5[%c0_155, %c0_156] : memref<1x64xf32, #tpu.memory_space<vmem>>, vector<1x64xf32>
    %256 = vector.broadcast %255 : vector<1x64xf32> to vector<8x64xf32>
    %257 = arith.addf %254, %256 : vector<8x64xf32>
    %cst_157 = arith.constant 0.000000e+00 : f32
    %258 = vector.broadcast %cst_157 : f32 to vector<8x64xf32>
    %259 = arith.maximumf %257, %258 : vector<8x64xf32>
    %260 = arith.truncf %259 : vector<8x64xf32> to vector<8x64xbf16>
    %c0_158 = arith.constant 0 : index
    %c0_159 = arith.constant 0 : index
    %261 = vector.load %arg6[%c0_158, %c0_159] : memref<64x32xbf16, #tpu.memory_space<vmem>>, vector<64x32xbf16>
    %cst_160 = arith.constant dense<0.000000e+00> : vector<8x32xf32>
    %262 = tpu.matmul %260, %261, %cst_160 {dimension_numbers = #tpu.dot_dimension_numbers<[1], [0], [0], [1], [0, 0, 1, 1], [], []>} : vector<8x64xbf16>, vector<64x32xbf16>, vector<8x32xf32> -> vector<8x32xf32>
    %c0_161 = arith.constant 0 : index
    %c0_162 = arith.constant 0 : index
    %263 = vector.load %arg7[%c0_161, %c0_162] : memref<1x32xf32, #tpu.memory_space<vmem>>, vector<1x32xf32>
    %264 = vector.broadcast %263 : vector<1x32xf32> to vector<8x32xf32>
    %265 = arith.addf %262, %264 : vector<8x32xf32>
    %c0_163 = arith.constant 0 : index
    %c0_164 = arith.constant 0 : index
    %266 = vector.load %arg8[%c0_163, %c0_164] : memref<8x32xf32, #tpu.memory_space<vmem>>, vector<8x32xf32>
    tpu.vector_store %arg8[%c0_163, %c0_164], %265 {strides = array<i32>} : memref<8x32xf32, #tpu.memory_space<vmem>>, vector<8x32xf32>,
    return
  }
  func.func @transform_0(%arg0: i32) -> (i32, i32) {
    %c0_i32 = arith.constant 0 : i32
    %c0_i32_0 = arith.constant 0 : i32
    %c0_i32_1 = arith.constant 0 : i32
    return %c0_i32, %c0_i32_0 : i32, i32
  }
  func.func @transform_1(%arg0: i32) -> (i32, i32) {
    %c0_i32 = arith.constant 0 : i32
    %c0_i32_0 = arith.constant 0 : i32
    %c0_i32_1 = arith.constant 0 : i32
    return %c0_i32, %c0_i32_0 : i32, i32
  }
  func.func @transform_2(%arg0: i32) -> (i32, i32) {
    %c0_i32 = arith.constant 0 : i32
    %c0_i32_0 = arith.constant 0 : i32
    %c0_i32_1 = arith.constant 0 : i32
    return %c0_i32, %c0_i32_0 : i32, i32
  }
  func.func @transform_3(%arg0: i32) -> (i32, i32, i32) {
    %c0_i32 = arith.constant 0 : i32
    %c0_i32_0 = arith.constant 0 : i32
    %c0_i32_1 = arith.constant 0 : i32
    %c0_i32_2 = arith.constant 0 : i32
    return %c0_i32, %c0_i32_0, %c0_i32_1 : i32, i32, i32
  }
  func.func @transform_4(%arg0: i32) -> (i32, i32) {
    %c0_i32 = arith.constant 0 : i32
    %c0_i32_0 = arith.constant 0 : i32
    %c0_i32_1 = arith.constant 0 : i32
    return %c0_i32, %c0_i32_0 : i32, i32
  }
  func.func @transform_5(%arg0: i32) -> (i32, i32) {
    %c0_i32 = arith.constant 0 : i32
    %c0_i32_0 = arith.constant 0 : i32
    %c0_i32_1 = arith.constant 0 : i32
    return %c0_i32, %c0_i32_0 : i32, i32
  }
  func.func @transform_6(%arg0: i32) -> (i32, i32) {
    %c0_i32 = arith.constant 0 : i32
    %c0_i32_0 = arith.constant 0 : i32
    %c0_i32_1 = arith.constant 0 : i32
    return %c0_i32, %c0_i32_0 : i32, i32
  }
  func.func @transform_7(%arg0: i32) -> (i32, i32) {
    %c0_i32 = arith.constant 0 : i32
    %c0_i32_0 = arith.constant 0 : i32
    %c0_i32_1 = arith.constant 0 : i32
    return %c0_i32, %c0_i32_0 : i32, i32
  }
}

</mosaic_0001>

<bundles_post_ra>
// kernel: triplet_net_forward.1
= control target key start
LH: loop header
LB: loop body
LE: loop exit
PB: predicated region body
PF: predicated region fallthrough
CT: control target
= control target key end

     0   :  { %vm299_vm0 = vcmask 1041408   ;;  %vm223_vm1 = vcmask 293888   ;;  %vm545_vm2 = vcmask 130048   ;;  %vm1849_vm3 = vcmask 523264   ;;  %s2903_s1 = inlined_call_operand.vmem [shape: bf16[36,16], index: 1, kind: input, shape index: {}]   ;;  %s2904_s2 = inlined_call_operand.vmem [shape: f32[1,16], index: 2, kind: input, shape index: {}]   ;;  %s2905_s0 = inlined_call_operand.vmem [shape: bf16[392,36], index: 0, kind: input, shape index: {}]   ;;  %s2906_s3 = inlined_call_operand.vmem [shape: bf16[49,16,64], index: 3, kind: input, shape index: {}]   ;;  %s2907_s4 = inlined_call_operand.vmem [shape: f32[1,64], index: 4, kind: input, shape index: {}]   ;;  %s2908_s6 = inlined_call_operand.vmem [shape: f32[1,32], index: 6, kind: input, shape index: {}]   ;;  %s2909_s5 = inlined_call_operand.vmem [shape: bf16[64,32], index: 5, kind: input, shape index: {}]   ;;  %s2910_s7 = inlined_call_operand.vmem [shape: f32[8,32], index: 7, kind: output, shape index: {}]  }
   0x1   :  { %v80_v0 = vld [vmem:[%s2903_s1 + $0x10] sm:$0x3]  ;;  %v2384_v4 = vld [vmem:[%s2903_s1 + $0x8] sm:$0xff]  ;;  %v2383_v5 = vld [vmem:[%s2903_s1] sm:$0xff]  ;;  %vm1866_vm4 = vcmask 261120  }
   0x2   :  { %v217_v1 = vunpack.c.l.b16 %v80_v0  ;;  %v2359_v6 = vld [vmem:[%s2905_s0] sm:$0xff]  ;;  %v2360_v7 = vld [vmem:[%s2905_s0 + $0x8] sm:$0xff]  ;;  %v2361_v8 = vld [vmem:[%s2905_s0 + $0x10] sm:$0xff] }
   0x3   :  { %v2362_v9 = vld [vmem:[%s2905_s0 + $0x18] sm:$0xff]  ;;  %v2363_v10 = vld [vmem:[%s2905_s0 + $0x20] sm:$0xff]  ;;  %v2381_v12 = vld [vmem:[%s2905_s0 + $0xb0] sm:$0xff] }
   0x4   :  { %v220_v2 = vpack.c.b16 %v217_v1, %v217_v1  ;;  %v2379_v11 = vld [vmem:[%s2905_s0 + $0xa0] sm:$0xff]  ;;  %v2364_v13 = vld [vmem:[%s2905_s0 + $0x28] sm:$0xff]  ;;  %v2382_v15 = vld [vmem:[%s2905_s0 + $0xb8] sm:$0xff] }
   0x5   :  { %v2380_v14 = vld [vmem:[%s2905_s0 + $0xa8] sm:$0xff]  ;;  %v2378_v16 = vld [vmem:[%s2905_s0 + $0x98] sm:$0xff]  ;;  %v2365_v17 = vld [vmem:[%s2905_s0 + $0x30] sm:$0xff] }
   0x6   :  { %v301_v3 = vsel %vm299_vm0, %v220_v2, 0  ;;  %v2385_v18 = vld [vmem:[%s2906_s3] sm:$0xff]  ;;  %v2386_v22 = vld [vmem:[%s2906_s3 + $0x8] sm:$0xff]  ;;  %v2366_v23 = vld [vmem:[%s2905_s0 + $0x38] sm:$0xff] }
   0x7   :  { %308 = vmatpush.bf16.msra.mxu0 %v301_v3  ;;  %2439 = vmatpush.bf16.msra.mxu2 %v301_v3  ;;  %v75_v19 = vld [vmem:[%s2905_s0 + $0xc0] sm:$0xf]  ;;  %v2387_v24 = vld [vmem:[%s2906_s3 + $0x10] sm:$0xff]  ;;  %v2388_v25 = vld [vmem:[%s2906_s3 + $0x18] sm:$0xff] }
   0x8   :  { %2440 = vmatpush.bf16.msra.mxu3 %v301_v3  ;;  %2438 = vmatpush.bf16.msra.mxu1 %v301_v3  ;;  %v182_v20 = vunpack.c.l.b16 %v75_v19  ;;  %v2570_v26 = vld [vmem:[%s2904_s2] ss:$0 sm:$0xff]  ;;  %v2390_v35 = vld [vmem:[%s2906_s3 + $0x28] sm:$0xff]  ;;  %v2391_v41 = vld [vmem:[%s2906_s3 + $0x30] sm:$0xff] }
   0x9   :  { %v2367_v27 = vld [vmem:[%s2905_s0 + $0x40] sm:$0xff]  ;;  %v2368_v38 = vld [vmem:[%s2905_s0 + $0x48] sm:$0xff]  ;;  %v2392_v46 = vld [vmem:[%s2906_s3 + $0x38] sm:$0xff] }
   0xa   :  { %v207_v21 = vpack.c.b16 %v182_v20, %v182_v20  ;;  %v2389_v30 = vld [vmem:[%s2906_s3 + $0x20] sm:$0xff]  ;;  %v2369_v49 = vld [vmem:[%s2905_s0 + $0x50] sm:$0xff]  ;;  %v2394_v57 = vld [vmem:[%s2906_s3 + $0x48] sm:$0xff] }
   0xb   :  { %309 = vmatpush.bf16.msra.mxu0 %v2384_v4  ;;  %2442 = vmatpush.bf16.msra.mxu2 %v2384_v4  ;;  %v2393_v52 = vld [vmem:[%s2906_s3 + $0x40] sm:$0xff]  ;;  %v2370_v60 = vld [vmem:[%s2905_s0 + $0x58] sm:$0xff]  ;;  %v2395_v63 = vld [vmem:[%s2906_s3 + $0x50] sm:$0xff] }
   0xc   :  { %2443 = vmatpush.bf16.msra.mxu3 %v2384_v4  ;;  %2441 = vmatpush.bf16.msra.mxu1 %v2384_v4  ;;  %v2396_v4 = vld [vmem:[%s2906_s3 + $0x58] sm:$0xff]  ;;  %v2372_v19 = vld [vmem:[%s2905_s0 + $0x68] sm:$0xff] }
   0xf   :  { %310 = vmatpush.bf16.msra.mxu0 %v2383_v5  ;;  %2445 = vmatpush.bf16.msra.mxu2 %v2383_v5 }
  0x10   :  { %2446 = vmatpush.bf16.msra.mxu3 %v2383_v5  ;;  %2444 = vmatpush.bf16.msra.mxu1 %v2383_v5 }
  0x12   :  { %1976 = vmatmul.msk.bf16.vlgmr.msra.gmra.mxu0 %vm223_vm1, %v2359_v6  ;;  %1996 = vmatmul.msk.bf16.vlgmr.msra.gmra.mxu2 %vm223_vm1, %v2379_v11 }
  0x13   :  { %1998 = vmatmul.msk.bf16.vlgmr.msra.gmra.mxu3 %vm223_vm1, %v2381_v12  ;;  %1995 = vmatmul.msk.bf16.vlgmr.msra.gmra.mxu1 %vm223_vm1, %v2378_v16  ;;  %v2398_v16 = vld [vmem:[%s2906_s3 + $0x68] sm:$0xff] }
  0x14   :  { %578 = vmatpush.bf16.msrb.mxu2 %v2385_v18  ;;  %556 = vmatpush.bf16.msrb.mxu1 %v2386_v22 }
  0x15   :  { %603 = vmatpush.bf16.msrb.mxu3 %v2387_v24 }
  0x18   :  { %629 = vmatpush.bf16.msra.mxu1 %v2388_v25  ;;  %655 = vmatpush.bf16.msra.mxu2 %v2389_v30  ;;  %v2400_v30 = vld [vmem:[%s2906_s3 + $0x78] sm:$0xff] }
  0x19   :  { %681 = vmatpush.bf16.msra.mxu3 %v2390_v35 }
  0x22   :  { %1977 = vmatmul.msk.bf16.gmra.mxu0 %vm223_vm1, %v2360_v7  ;;  %1997 = vmatmul.msk.bf16.gmra.mxu2 %vm223_vm1, %v2380_v14  ;;  %v2371_v7 = vld [vmem:[%s2905_s0 + $0x60] sm:$0xff] }
  0x23   :  { %1999 = vmatmul.msk.bf16.gmra.mxu3 %vm223_vm1, %v2382_v15 }
  0x32   :  { %1978 = vmatmul.msk.bf16.gmra.mxu0 %vm223_vm1, %v2361_v8 }
  0x33   :  { %2000 = vmatmul.msk.bf16.gmra.mxu3 %vm223_vm1, %v207_v21 }
  0x42   :  { %1979 = vmatmul.msk.bf16.gmra.mxu0 %vm223_vm1, %v2362_v9 }
  0x52   :  { %1980 = vmatmul.msk.bf16.gmra.mxu0 %vm223_vm1, %v2363_v10  ;;  %v2397_v10 = vld [vmem:[%s2906_s3 + $0x60] sm:$0xff] }
  0x62   :  { %1981 = vmatmul.msk.bf16.gmra.mxu0 %vm223_vm1, %v2364_v13 }
  0x72   :  { %1982 = vmatmul.msk.bf16.gmra.mxu0 %vm223_vm1, %v2365_v17 }
  0x82   :  { %1983 = vmatmul.msk.bf16.gmra.mxu0 %vm223_vm1, %v2366_v23  ;;  %v2399_v23 = vld [vmem:[%s2906_s3 + $0x70] sm:$0xff] }
  0x8f   :  { %v312_v28 = vpop.f32.mrf.mxu0 }
  0x90   :  { %v313_v29 = vadd.f32 %v2570_v26, %v312_v28 }
  0x92   :  { %v436_v31 = vmax.f32 %v313_v29, 0.0  ;;  %1984 = vmatmul.msk.bf16.gmra.mxu0 %vm223_vm1, %v2367_v27 }
  0x94   :  { %v485_v32 = vpack.c.bf16 %v436_v31, %v436_v31 }
  0x96   :  { %2012 = vmatmul.msk.bf16.vlgmr.msrb.gmra.mxu2 %vm545_vm2, %v485_v32  ;;  %v2638_v15 = vpop.f32.mrf.mxu3 }
  0x97   :  { %v314_v33 = vpop.f32.mrf.mxu0  ;;  %733 = vmatpush.bf16.msrb.mxu2 %v2392_v46 }
  0x98   :  { %v315_v34 = vadd.f32 %v2570_v26, %v314_v33  ;;  %v2373_v33 = vld [vmem:[%s2905_s0 + $0x70] sm:$0xff] }
  0x9a   :  { %v437_v36 = vmax.f32 %v315_v34, 0.0 }
  0x9c   :  { %v486_v37 = vpack.c.bf16 %v437_v36, %v437_v36  ;;  %v2666_v36 = vpop.f32.mrf.mxu2 }
  0x9e   :  { %2007 = vmatmul.msk.bf16.vlgmr.msrb.gmra.mxu1 %vm545_vm2, %v486_v37  ;;  %v2648_v22 = vpop.f32.mrf.mxu3 }
  0x9f   :  { %v317_v39 = vpop.f32.mrf.mxu0  ;;  %707 = vmatpush.bf16.msrb.mxu1 %v2391_v41 }
  0xa0   :  { %v318_v40 = vadd.f32 %v2570_v26, %v317_v39 }
  0xa2   :  { %v438_v42 = vmax.f32 %v318_v40, 0.0  ;;  %1985 = vmatmul.msk.bf16.gmra.mxu0 %vm223_vm1, %v2368_v38  ;;  %v2401_v38 = vld [vmem:[%s2906_s3 + $0x80] sm:$0xff] }
  0xa4   :  { %v487_v43 = vpack.c.bf16 %v438_v42, %v438_v42  ;;  %v2681_v46 = vpop.f32.mrf.mxu2 }
  0xa6   :  { %2019 = vmatmul.msk.bf16.vlgmr.msrb.gmra.mxu3 %vm545_vm2, %v487_v43  ;;  %v2656_v29 = vpop.f32.mrf.mxu3 }
  0xa7   :  { %v319_v44 = vpop.f32.mrf.mxu0  ;;  %759 = vmatpush.bf16.msrb.mxu3 %v2393_v52  ;;  %v2403_v52 = vld [vmem:[%s2906_s3 + $0x90] sm:$0xff] }
  0xa8   :  { %v320_v45 = vadd.f32 %v2570_v26, %v319_v44  ;;  %v2402_v44 = vld [vmem:[%s2906_s3 + $0x88] sm:$0xff] }
  0xaa   :  { %v439_v47 = vmax.f32 %v320_v45, 0.0 }
  0xac   :  { %v488_v48 = vpack.c.bf16 %v439_v47, %v439_v47 }
  0xae   :  { %2026 = vmatmul.msk.bf16.vlgmr.msra.gmra.mxu1 %vm545_vm2, %v488_v48  ;;  %v2668_v37 = vpop.f32.mrf.mxu3  ;;  %v2374_v48 = vld [vmem:[%s2905_s0 + $0x78] sm:$0xff] }
  0xaf   :  { %v322_v50 = vpop.f32.mrf.mxu0  ;;  %785 = vmatpush.bf16.msra.mxu1 %v2394_v57  ;;  %v2695_v57 = vpop.f32.mrf.mxu1 }
  0xb0   :  { %v323_v51 = vadd.f32 %v2570_v26, %v322_v50 }
  0xb2   :  { %v440_v53 = vmax.f32 %v323_v51, 0.0  ;;  %1986 = vmatmul.msk.bf16.gmra.mxu0 %vm223_vm1, %v2369_v49 }
  0xb4   :  { %v489_v54 = vpack.c.bf16 %v440_v53, %v440_v53 }
  0xb6   :  { %2033 = vmatmul.msk.bf16.vlgmr.msra.gmra.mxu2 %vm545_vm2, %v489_v54  ;;  %v2676_v43 = vpop.f32.mrf.mxu3 }
  0xb7   :  { %v324_v55 = vpop.f32.mrf.mxu0  ;;  %811 = vmatpush.bf16.msra.mxu2 %v2395_v63 }
  0xb8   :  { %v325_v56 = vadd.f32 %v2570_v26, %v324_v55  ;;  %v2692_v55 = vpop.f32.mrf.mxu2 }
  0xba   :  { %v441_v58 = vmax.f32 %v325_v56, 0.0 }
  0xbc   :  { %v490_v59 = vpack.c.bf16 %v441_v58, %v441_v58 }
  0xbe   :  { %2040 = vmatmul.msk.bf16.vlgmr.msra.gmra.mxu3 %vm545_vm2, %v490_v59  ;;  %v434_v51 = vpop.f32.mrf.mxu3  ;;  %v2404_v59 = vld [vmem:[%s2906_s3 + $0x98] sm:$0xff] }
  0xbf   :  { %v327_v61 = vpop.f32.mrf.mxu0  ;;  %837 = vmatpush.bf16.msra.mxu3 %v2396_v4 }
  0xc0   :  { %v328_v62 = vadd.f32 %v2570_v26, %v327_v61 }
  0xc2   :  { %v442_v0 = vmax.f32 %v328_v62, 0.0  ;;  %1987 = vmatmul.msk.bf16.gmra.mxu0 %vm223_vm1, %v2370_v60  ;;  %v2375_v62 = vld [vmem:[%s2905_s0 + $0x80] sm:$0xff] }
  0xc4   :  { %v491_v1 = vpack.c.bf16 %v442_v0, %v442_v0  ;;  %v2705_v0 = vpop.f32.mrf.mxu2 }
  0xc6   :  { %2047 = vmatmul.msk.bf16.vlgmr.msrb.gmra.mxu1 %vm545_vm2, %v491_v1 }
  0xc7   :  { %v329_v2 = vpop.f32.mrf.mxu0  ;;  %863 = vmatpush.bf16.msrb.mxu1 %v2397_v10 }
  0xc8   :  { %v330_v3 = vadd.f32 %v2570_v26, %v329_v2  ;;  %v2708_v2 = vpop.f32.mrf.mxu1 }
  0xca   :  { %v443_v5 = vmax.f32 %v330_v3, 0.0  ;;  %v2405_v3 = vld [vmem:[%s2906_s3 + $0xa0] sm:$0xff] }
  0xcc   :  { %v492_v6 = vpack.c.bf16 %v443_v5, %v443_v5 }
  0xce   :  { %2054 = vmatmul.msk.bf16.vlgmr.msrb.gmra.mxu2 %vm545_vm2, %v492_v6 }
  0xcf   :  { %v332_v8 = vpop.f32.mrf.mxu0  ;;  %889 = vmatpush.bf16.msrb.mxu2 %v2398_v16 }
  0xd0   :  { %v333_v9 = vadd.f32 %v2570_v26, %v332_v8 }
  0xd2   :  { %v444_v11 = vmax.f32 %v333_v9, 0.0  ;;  %1988 = vmatmul.msk.bf16.gmra.mxu0 %vm223_vm1, %v2371_v7  ;;  %v2406_v9 = vld [vmem:[%s2906_s3 + $0xa8] sm:$0xff] }
  0xd4   :  { %v493_v12 = vpack.c.bf16 %v444_v11, %v444_v11 }
  0xd6   :  { %2061 = vmatmul.msk.bf16.vlgmr.msrb.gmra.mxu3 %vm545_vm2, %v493_v12 }
  0xd7   :  { %v334_v13 = vpop.f32.mrf.mxu0  ;;  %915 = vmatpush.bf16.msrb.mxu3 %v2399_v23 }
  0xd8   :  { %v335_v14 = vadd.f32 %v2570_v26, %v334_v13 }
  0xda   :  { %v445_v17 = vmax.f32 %v335_v14, 0.0  ;;  %v2376_v14 = vld [vmem:[%s2905_s0 + $0x88] sm:$0xff] }
  0xdc   :  { %v494_v18 = vpack.c.bf16 %v445_v17, %v445_v17 }
  0xde   :  { %2068 = vmatmul.msk.bf16.vlgmr.msra.gmra.mxu1 %vm545_vm2, %v494_v18 }
  0xdf   :  { %v337_v20 = vpop.f32.mrf.mxu0  ;;  %941 = vmatpush.bf16.msra.mxu1 %v2400_v30 }
  0xe0   :  { %v338_v21 = vadd.f32 %v2570_v26, %v337_v20 }
  0xe2   :  { %v446_v24 = vmax.f32 %v338_v21, 0.0  ;;  %1989 = vmatmul.msk.bf16.gmra.mxu0 %vm223_vm1, %v2372_v19  ;;  %v2407_v19 = vld [vmem:[%s2906_s3 + $0xb0] sm:$0xff] }
  0xe4   :  { %v495_v25 = vpack.c.bf16 %v446_v24, %v446_v24 }
  0xe6   :  { %2075 = vmatmul.msk.bf16.vlgmr.msra.gmra.mxu2 %vm545_vm2, %v495_v25 }
  0xe7   :  { %v339_v27 = vpop.f32.mrf.mxu0  ;;  %967 = vmatpush.bf16.msra.mxu2 %v2401_v38 }
  0xe8   :  { %v340_v28 = vadd.f32 %v2570_v26, %v339_v27 }
  0xea   :  { %v447_v31 = vmax.f32 %v340_v28, 0.0  ;;  %v2408_v28 = vld [vmem:[%s2906_s3 + $0xb8] sm:$0xff] }
  0xec   :  { %v496_v32 = vpack.c.bf16 %v447_v31, %v447_v31 }
  0xee   :  { %2082 = vmatmul.msk.bf16.vlgmr.msra.gmra.mxu3 %vm545_vm2, %v496_v32 }
  0xef   :  { %v342_v34 = vpop.f32.mrf.mxu0  ;;  %993 = vmatpush.bf16.msra.mxu3 %v2402_v44 }
  0xf0   :  { %v343_v35 = vadd.f32 %v2570_v26, %v342_v34 }
  0xf2   :  { %v448_v39 = vmax.f32 %v343_v35, 0.0  ;;  %1990 = vmatmul.msk.bf16.gmra.mxu0 %vm223_vm1, %v2373_v33  ;;  %v2377_v35 = vld [vmem:[%s2905_s0 + $0x90] sm:$0xff] }
  0xf4   :  { %v497_v40 = vpack.c.bf16 %v448_v39, %v448_v39 }
  0xf6   :  { %2089 = vmatmul.msk.bf16.vlgmr.msrb.gmra.mxu1 %vm545_vm2, %v497_v40 }
  0xf7   :  { %v344_v41 = vpop.f32.mrf.mxu0  ;;  %1019 = vmatpush.bf16.msrb.mxu1 %v2403_v52 }
  0xf8   :  { %v345_v42 = vadd.f32 %v2570_v26, %v344_v41  ;;  %v2409_v41 = vld [vmem:[%s2906_s3 + $0xc0] sm:$0xff] }
  0xfa   :  { %v449_v45 = vmax.f32 %v345_v42, 0.0 }
  0xfc   :  { %v498_v47 = vpack.c.bf16 %v449_v45, %v449_v45 }
  0xfe   :  { %2096 = vmatmul.msk.bf16.vlgmr.msrb.gmra.mxu2 %vm545_vm2, %v498_v47 }
  0xff   :  { %v347_v49 = vpop.f32.mrf.mxu0  ;;  %1045 = vmatpush.bf16.msrb.mxu2 %v2404_v59 }
 0x100   :  { %v348_v50 = vadd.f32 %v2570_v26, %v347_v49 }
 0x102   :  { %v450_v53 = vmax.f32 %v348_v50, 0.0  ;;  %1991 = vmatmul.msk.bf16.gmra.mxu0 %vm223_vm1, %v2374_v48  ;;  %v2410_v50 = vld [vmem:[%s2906_s3 + $0xc8] sm:$0xff] }
 0x104   :  { %v499_v54 = vpack.c.bf16 %v450_v53, %v450_v53 }
 0x106   :  { %2103 = vmatmul.msk.bf16.vlgmr.msrb.gmra.mxu3 %vm545_vm2, %v499_v54 }
 0x107   :  { %v349_v56 = vpop.f32.mrf.mxu0  ;;  %1071 = vmatpush.bf16.msrb.mxu3 %v2405_v3 }
 0x108   :  { %v350_v58 = vadd.f32 %v2570_v26, %v349_v56 }
 0x10a   :  { %v451_v60 = vmax.f32 %v350_v58, 0.0 }
 0x10c   :  { %v500_v61 = vpack.c.bf16 %v451_v60, %v451_v60  ;;  %v2411_v60 = vld [vmem:[%s2906_s3 + $0xd0] sm:$0xff] }
 0x10e   :  { %2110 = vmatmul.msk.bf16.vlgmr.msra.gmra.mxu1 %vm545_vm2, %v500_v61 }
 0x10f   :  { %v352_v63 = vpop.f32.mrf.mxu0  ;;  %1097 = vmatpush.bf16.msra.mxu1 %v2406_v9 }
 0x110   :  { %v353_v1 = vadd.f32 %v2570_v26, %v352_v63 }
 0x112   :  { %v452_v4 = vmax.f32 %v353_v1, 0.0  ;;  %1992 = vmatmul.msk.bf16.gmra.mxu0 %vm223_vm1, %v2375_v62 }
 0x114   :  { %v501_v5 = vpack.c.bf16 %v452_v4, %v452_v4 }
 0x116   :  { %2117 = vmatmul.msk.bf16.vlgmr.msra.gmra.mxu2 %vm545_vm2, %v501_v5 }
 0x117   :  { %v354_v6 = vpop.f32.mrf.mxu0  ;;  %1123 = vmatpush.bf16.msra.mxu2 %v2407_v19 }
 0x118   :  { %v355_v7 = vadd.f32 %v2570_v26, %v354_v6 }
 0x119   :  { %v580_v8 = vpop.f32.mrf.mxu2 }
 0x11a   :  { %v453_v10 = vmax.f32 %v355_v7, 0.0  ;;  %v2412_v7 = vld [vmem:[%s2906_s3 + $0xd8] sm:$0xff] }
 0x11b   :  { %v558_v11 = vpop.f32.mrf.mxu1 }
 0x11c   :  { %v502_v12 = vpack.c.bf16 %v453_v10, %v453_v10  ;;  %v581_v13 = vadd.f32 %v580_v8, %v558_v11 }
 0x11e   :  { %2124 = vmatmul.msk.bf16.vlgmr.msra.gmra.mxu3 %vm545_vm2, %v502_v12 }
 0x11f   :  { %v357_v16 = vpop.f32.mrf.mxu0  ;;  %1149 = vmatpush.bf16.msra.mxu3 %v2408_v28 }
 0x120   :  { %v358_v17 = vadd.f32 %v2570_v26, %v357_v16 }
 0x121   :  { %v582_v18 = vpop.f32.mrf.mxu2 }
 0x122   :  { %v454_v20 = vmax.f32 %v358_v17, 0.0  ;;  %1993 = vmatmul.msk.bf16.gmra.mxu0 %vm223_vm1, %v2376_v14  ;;  %v2413_v14 = vld [vmem:[%s2906_s3 + $0xe0] sm:$0xff] }
 0x123   :  { %v560_v21 = vpop.f32.mrf.mxu1 }
 0x124   :  { %v503_v23 = vpack.c.bf16 %v454_v20, %v454_v20 }
 0x126   :  { %2131 = vmatmul.msk.bf16.vlgmr.msrb.gmra.mxu1 %vm545_vm2, %v503_v23 }
 0x127   :  { %v359_v24 = vpop.f32.mrf.mxu0  ;;  %1175 = vmatpush.bf16.msrb.mxu1 %v2409_v41 }
 0x128   :  { %v360_v25 = vadd.f32 %v2570_v26, %v359_v24  ;;  %v2414_v24 = vld [vmem:[%s2906_s3 + $0xe8] sm:$0xff] }
 0x129   :  { %v605_v27 = vpop.f32.mrf.mxu3 }
 0x12a   :  { %v455_v30 = vmax.f32 %v360_v25, 0.0  ;;  %v609_v31 = vadd.f32 %v605_v27, %v581_v13 }
 0x12b   :  { %v631_v32 = vpop.f32.mrf.mxu1 }
 0x12c   :  { %v504_v33 = vpack.c.bf16 %v455_v30, %v455_v30  ;;  %v635_v34 = vadd.f32 %v631_v32, %v609_v31 }
 0x12e   :  { %2138 = vmatmul.msk.bf16.vlgmr.msrb.gmra.mxu2 %vm545_vm2, %v504_v33 }
 0x12f   :  { %v362_v38 = vpop.f32.mrf.mxu0  ;;  %1201 = vmatpush.bf16.msrb.mxu2 %v2410_v50 }
 0x130   :  { %v363_v39 = vadd.f32 %v2570_v26, %v362_v38 }
 0x131   :  { %v607_v40 = vpop.f32.mrf.mxu3 }
 0x132   :  { %v456_v42 = vmax.f32 %v363_v39, 0.0  ;;  %1994 = vmatmul.msk.bf16.gmra.mxu0 %vm223_vm1, %v2377_v35  ;;  %v2415_v35 = vld [vmem:[%s2906_s3 + $0xf0] sm:$0xff] }
 0x133   :  { %v633_v44 = vpop.f32.mrf.mxu1 }
 0x134   :  { %v505_v45 = vpack.c.bf16 %v456_v42, %v456_v42 }
 0x136   :  { %2145 = vmatmul.msk.bf16.vlgmr.msrb.gmra.mxu3 %vm545_vm2, %v505_v45  ;;  %v2416_v45 = vld [vmem:[%s2906_s3 + $0xf8] sm:$0xff] }
 0x137   :  { %v364_v47 = vpop.f32.mrf.mxu0  ;;  %1227 = vmatpush.bf16.msrb.mxu3 %v2411_v60 }
 0x138   :  { %v365_v48 = vadd.f32 %v2570_v26, %v364_v47 }
 0x139   :  { %v657_v49 = vpop.f32.mrf.mxu2 }
 0x13a   :  { %v457_v51 = vmax.f32 %v365_v48, 0.0  ;;  %v661_v52 = vadd.f32 %v657_v49, %v635_v34 }
 0x13c   :  { %v506_v53 = vpack.c.bf16 %v457_v51, %v457_v51 }
 0x13e   :  { %2152 = vmatmul.msk.bf16.vlgmr.msra.gmra.mxu1 %vm545_vm2, %v506_v53 }
 0x13f   :  { %v367_v54 = vpop.f32.mrf.mxu0  ;;  %1253 = vmatpush.bf16.msra.mxu1 %v2412_v7  ;;  %v2419_v7 = vld [vmem:[%s2906_s3 + $0x110] sm:$0xff] }
 0x140   :  { %v368_v56 = vadd.f32 %v2570_v26, %v367_v54  ;;  %v2417_v54 = vld [vmem:[%s2906_s3 + $0x100] sm:$0xff] }
 0x141   :  { %v659_v58 = vpop.f32.mrf.mxu2  ;;  %v683_v59 = vpop.f32.mrf.mxu3 }
 0x142   :  { %v458_v61 = vmax.f32 %v368_v56, 0.0  ;;  %v687_v62 = vadd.f32 %v683_v59, %v661_v52 }
 0x143   :  { %v709_v63 = vpop.f32.mrf.mxu1 }
 0x144   :  { %v507_v1 = vpack.c.bf16 %v458_v61, %v458_v61  ;;  %v713_v3 = vadd.f32 %v709_v63, %v687_v62 }
 0x146   :  { %2159 = vmatmul.msk.bf16.vlgmr.msra.gmra.mxu2 %vm545_vm2, %v507_v1 }
 0x147   :  { %v369_v4 = vpop.f32.mrf.mxu0  ;;  %1279 = vmatpush.bf16.msra.mxu2 %v2413_v14  ;;  %v2420_v14 = vld [vmem:[%s2906_s3 + $0x118] sm:$0xff] }
 0x148   :  { %v370_v5 = vadd.f32 %v2570_v26, %v369_v4 }
 0x149   :  { %v685_v6 = vpop.f32.mrf.mxu3 }
 0x14a   :  { %v459_v8 = vmax.f32 %v370_v5, 0.0 }
 0x14b   :  { %v711_v9 = vpop.f32.mrf.mxu1 }
 0x14c   :  { %v508_v10 = vpack.c.bf16 %v459_v8, %v459_v8 }
 0x14e   :  { %2166 = vmatmul.msk.bf16.vlgmr.msra.gmra.mxu3 %vm545_vm2, %v508_v10 }
 0x14f   :  { %v372_v11 = vpop.f32.mrf.mxu0  ;;  %1305 = vmatpush.bf16.msra.mxu3 %v2414_v24 }
 0x150   :  { %v373_v12 = vadd.f32 %v2570_v26, %v372_v11 }
 0x151   :  { %v735_v13 = vpop.f32.mrf.mxu2 }
 0x152   :  { %v460_v16 = vmax.f32 %v373_v12, 0.0  ;;  %v739_v17 = vadd.f32 %v735_v13, %v713_v3  ;;  %v2418_v3 = vld [vmem:[%s2906_s3 + $0x108] sm:$0xff] }
 0x154   :  { %v509_v18 = vpack.c.bf16 %v460_v16, %v460_v16 }
 0x156   :  { %2173 = vmatmul.msk.bf16.vlgmr.msrb.gmra.mxu1 %vm545_vm2, %v509_v18 }
 0x157   :  { %v374_v19 = vpop.f32.mrf.mxu0  ;;  %1331 = vmatpush.bf16.msrb.mxu1 %v2415_v35 }
 0x158   :  { %v375_v20 = vadd.f32 %v2570_v26, %v374_v19 }
 0x159   :  { %v737_v21 = vpop.f32.mrf.mxu2  ;;  %v761_v23 = vpop.f32.mrf.mxu3 }
 0x15a   :  { %v461_v25 = vmax.f32 %v375_v20, 0.0  ;;  %v765_v27 = vadd.f32 %v761_v23, %v739_v17 }
 0x15b   :  { %v787_v28 = vpop.f32.mrf.mxu1 }
 0x15c   :  { %v510_v30 = vpack.c.bf16 %v461_v25, %v461_v25  ;;  %v791_v31 = vadd.f32 %v787_v28, %v765_v27  ;;  %v2421_v27 = vld [vmem:[%s2906_s3 + $0x120] sm:$0xff]  ;;  %v2422_v28 = vld [vmem:[%s2906_s3 + $0x128] sm:$0xff] }
 0x15e   :  { %2180 = vmatmul.msk.bf16.vlgmr.msrb.gmra.mxu2 %vm545_vm2, %v510_v30 }
 0x15f   :  { %v377_v32 = vpop.f32.mrf.mxu0  ;;  %1357 = vmatpush.bf16.msrb.mxu2 %v2416_v45 }
 0x160   :  { %v378_v33 = vadd.f32 %v2570_v26, %v377_v32 }
 0x161   :  { %v763_v34 = vpop.f32.mrf.mxu3 }
 0x162   :  { %v462_v38 = vmax.f32 %v378_v33, 0.0 }
 0x163   :  { %v789_v39 = vpop.f32.mrf.mxu1 }
 0x164   :  { %v511_v40 = vpack.c.bf16 %v462_v38, %v462_v38  ;;  %v2423_v38 = vld [vmem:[%s2906_s3 + $0x130] sm:$0xff] }
 0x166   :  { %2187 = vmatmul.msk.bf16.vlgmr.msrb.gmra.mxu3 %vm545_vm2, %v511_v40 }
 0x167   :  { %v379_v41 = vpop.f32.mrf.mxu0  ;;  %1383 = vmatpush.bf16.msrb.mxu3 %v2417_v54 }
 0x168   :  { %v380_v42 = vadd.f32 %v2570_v26, %v379_v41 }
 0x169   :  { %v813_v44 = vpop.f32.mrf.mxu2 }
 0x16a   :  { %v463_v47 = vmax.f32 %v380_v42, 0.0  ;;  %v817_v48 = vadd.f32 %v813_v44, %v791_v31 }
 0x16c   :  { %v512_v49 = vpack.c.bf16 %v463_v47, %v463_v47  ;;  %v2424_v47 = vld [vmem:[%s2906_s3 + $0x138] sm:$0xff] }
 0x16e   :  { %2194 = vmatmul.msk.bf16.vlgmr.msra.gmra.mxu1 %vm545_vm2, %v512_v49 }
 0x16f   :  { %v382_v50 = vpop.f32.mrf.mxu0  ;;  %1409 = vmatpush.bf16.msra.mxu1 %v2418_v3  ;;  %v2426_v3 = vld [vmem:[%s2906_s3 + $0x148] sm:$0xff] }
 0x170   :  { %v383_v51 = vadd.f32 %v2570_v26, %v382_v50 }
 0x171   :  { %v815_v52 = vpop.f32.mrf.mxu2  ;;  %v839_v53 = vpop.f32.mrf.mxu3 }
 0x172   :  { %v464_v56 = vmax.f32 %v383_v51, 0.0  ;;  %v843_v58 = vadd.f32 %v839_v53, %v817_v48 }
 0x173   :  { %v865_v59 = vpop.f32.mrf.mxu1 }
 0x174   :  { %v513_v60 = vpack.c.bf16 %v464_v56, %v464_v56  ;;  %v869_v61 = vadd.f32 %v865_v59, %v843_v58  ;;  %v2425_v56 = vld [vmem:[%s2906_s3 + $0x140] sm:$0xff] }
 0x176   :  { %2201 = vmatmul.msk.bf16.vlgmr.msra.gmra.mxu2 %vm545_vm2, %v513_v60 }
 0x177   :  { %v384_v62 = vpop.f32.mrf.mxu0  ;;  %1435 = vmatpush.bf16.msra.mxu2 %v2419_v7 }
 0x178   :  { %v385_v63 = vadd.f32 %v2570_v26, %v384_v62 }
 0x179   :  { %v841_v1 = vpop.f32.mrf.mxu3 }
 0x17a   :  { %v465_v4 = vmax.f32 %v385_v63, 0.0 }
 0x17b   :  { %v867_v5 = vpop.f32.mrf.mxu1 }
 0x17c   :  { %v514_v6 = vpack.c.bf16 %v465_v4, %v465_v4 }
 0x17e   :  { %2208 = vmatmul.msk.bf16.vlgmr.msra.gmra.mxu3 %vm545_vm2, %v514_v6 }
 0x17f   :  { %v387_v8 = vpop.f32.mrf.mxu0  ;;  %1461 = vmatpush.bf16.msra.mxu3 %v2420_v14 }
 0x180   :  { %v388_v9 = vadd.f32 %v2570_v26, %v387_v8 }
 0x181   :  { %v891_v10 = vpop.f32.mrf.mxu2 }
 0x182   :  { %v466_v11 = vmax.f32 %v388_v9, 0.0  ;;  %v895_v12 = vadd.f32 %v891_v10, %v869_v61  ;;  %v2427_v10 = vld [vmem:[%s2906_s3 + $0x150] sm:$0xff] }
 0x184   :  { %v515_v13 = vpack.c.bf16 %v466_v11, %v466_v11  ;;  %v408_v11 = vadd.f32 %v2570_v26, %v2695_v57  ;;  %v2429_v57 = vld [vmem:[%s2906_s3 + $0x160] sm:$0xff] }
 0x186   :  { %2215 = vmatmul.msk.bf16.vlgmr.msrb.gmra.mxu1 %vm545_vm2, %v515_v13  ;;  %v474_v14 = vmax.f32 %v408_v11, 0.0 }
 0x187   :  { %v389_v16 = vpop.f32.mrf.mxu0  ;;  %1487 = vmatpush.bf16.msrb.mxu1 %v2421_v27 }
 0x188   :  { %v390_v17 = vadd.f32 %v2570_v26, %v389_v16 }
 0x189   :  { %v893_v18 = vpop.f32.mrf.mxu2  ;;  %v917_v19 = vpop.f32.mrf.mxu3 }
 0x18a   :  { %v467_v20 = vmax.f32 %v390_v17, 0.0  ;;  %v921_v21 = vadd.f32 %v917_v19, %v895_v12 }
 0x18b   :  { %v943_v23 = vpop.f32.mrf.mxu1 }
 0x18c   :  { %v516_v24 = vpack.c.bf16 %v467_v20, %v467_v20  ;;  %v947_v25 = vadd.f32 %v943_v23, %v921_v21  ;;  %v2428_v23 = vld [vmem:[%s2906_s3 + $0x158] sm:$0xff] }
 0x18e   :  { %2222 = vmatmul.msk.bf16.vlgmr.msrb.gmra.mxu2 %vm545_vm2, %v516_v24  ;;  %v523_v24 = vpack.c.bf16 %v474_v14, %v474_v14  ;;  %v433_v14 = vadd.f32 %v2570_v26, %v2676_v43 }
 0x18f   :  { %v392_v30 = vpop.f32.mrf.mxu0  ;;  %1513 = vmatpush.bf16.msrb.mxu2 %v2422_v28 }
 0x190   :  { %v393_v31 = vadd.f32 %v2570_v26, %v392_v30 }
 0x191   :  { %v919_v32 = vpop.f32.mrf.mxu3 }
 0x192   :  { %v468_v33 = vmax.f32 %v393_v31, 0.0 }
 0x193   :  { %v945_v34 = vpop.f32.mrf.mxu1 }
 0x194   :  { %v517_v35 = vpack.c.bf16 %v468_v33, %v468_v33  ;;  %v2430_v33 = vld [vmem:[%s2906_s3 + $0x168] sm:$0xff]  ;;  %v413_v34 = vadd.f32 %v2570_v26, %v2666_v36 }
 0x196   :  { %2229 = vmatmul.msk.bf16.vlgmr.msrb.gmra.mxu3 %vm545_vm2, %v517_v35 }
 0x197   :  { %v394_v39 = vpop.f32.mrf.mxu0  ;;  %1539 = vmatpush.bf16.msrb.mxu3 %v2423_v38  ;;  %v476_v38 = vmax.f32 %v413_v34, 0.0 }
 0x198   :  { %v395_v40 = vadd.f32 %v2570_v26, %v394_v39 }
 0x199   :  { %v969_v41 = vpop.f32.mrf.mxu2  ;;  %v525_v36 = vpack.c.bf16 %v476_v38, %v476_v38 }
 0x19a   :  { %v469_v42 = vmax.f32 %v395_v40, 0.0  ;;  %v973_v44 = vadd.f32 %v969_v41, %v947_v25  ;;  %v410_v25 = vadd.f32 %v2570_v26, %v2708_v2  ;;  %v415_v2 = vadd.f32 %v2570_v26, %v2681_v46 }
 0x19b   :  { %v418_v46 = vadd.f32 %v2570_v26, %v2692_v55  ;;  %v420_v55 = vadd.f32 %v2570_v26, %v2705_v0 }
 0x19c   :  { %v518_v45 = vpack.c.bf16 %v469_v42, %v469_v42  ;;  %v475_v30 = vmax.f32 %v410_v25, 0.0  ;;  %v477_v39 = vmax.f32 %v415_v2, 0.0  ;;  %v2431_v42 = vld [vmem:[%s2906_s3 + $0x170] sm:$0xff] }
 0x19e   :  { %2236 = vmatmul.msk.bf16.vlgmr.msra.gmra.mxu1 %vm545_vm2, %v518_v45  ;;  %v524_v35 = vpack.c.bf16 %v475_v30, %v475_v30  ;;  %v526_v45 = vpack.c.bf16 %v477_v39, %v477_v39 }
 0x19f   :  { %v397_v48 = vpop.f32.mrf.mxu0  ;;  %1565 = vmatpush.bf16.msra.mxu1 %v2424_v47  ;;  %v478_v47 = vmax.f32 %v418_v46, 0.0 }
 0x1a0   :  { %v398_v49 = vadd.f32 %v2570_v26, %v397_v48 }
 0x1a1   :  { %v971_v50 = vpop.f32.mrf.mxu2  ;;  %v995_v51 = vpop.f32.mrf.mxu3 }
 0x1a2   :  { %v470_v52 = vmax.f32 %v398_v49, 0.0  ;;  %v999_v53 = vadd.f32 %v995_v51, %v973_v44  ;;  %v2432_v44 = vld [vmem:[%s2906_s3 + $0x178] sm:$0xff] }
 0x1a3   :  { %v1021_v54 = vpop.f32.mrf.mxu1 }
 0x1a4   :  { %v519_v58 = vpack.c.bf16 %v470_v52, %v470_v52  ;;  %v1025_v59 = vadd.f32 %v1021_v54, %v999_v53  ;;  %v2433_v52 = vld [vmem:[%s2906_s3 + $0x180] sm:$0xff]  ;;  %v423_v53 = vadd.f32 %v2570_v26, %v2638_v15  ;;  %v527_v54 = vpack.c.bf16 %v478_v47, %v478_v47 }
 0x1a6   :  { %2243 = vmatmul.msk.bf16.vlgmr.msra.gmra.mxu2 %vm545_vm2, %v519_v58  ;;  %v480_v58 = vmax.f32 %v423_v53, 0.0 }
 0x1a7   :  { %v399_v60 = vpop.f32.mrf.mxu0  ;;  %1591 = vmatpush.bf16.msra.mxu2 %v2425_v56 }
 0x1a8   :  { %v400_v61 = vadd.f32 %v2570_v26, %v399_v60 }
 0x1a9   :  { %v997_v62 = vpop.f32.mrf.mxu3 }
 0x1aa   :  { %v471_v63 = vmax.f32 %v400_v61, 0.0  ;;  %v529_v62 = vpack.c.bf16 %v480_v58, %v480_v58 }
 0x1ab   :  { %v1023_v1 = vpop.f32.mrf.mxu1 }
 0x1ac   :  { %v520_v4 = vpack.c.bf16 %v471_v63, %v471_v63  ;;  %v425_v63 = vadd.f32 %v2570_v26, %v2648_v22 }
 0x1ae   :  { %2250 = vmatmul.msk.bf16.vlgmr.msra.gmra.mxu3 %vm545_vm2, %v520_v4  ;;  %v481_v15 = vmax.f32 %v425_v63, 0.0 }
 0x1af   :  { %v402_v5 = vpop.f32.mrf.mxu0  ;;  %1617 = vmatpush.bf16.msra.mxu3 %v2426_v3 }
 0x1b0   :  { %v403_v6 = vadd.f32 %v2570_v26, %v402_v5  ;;  %v530_v4 = vpack.c.bf16 %v481_v15, %v481_v15  ;;  %v428_v5 = vadd.f32 %v2570_v26, %v2656_v29  ;;  %v484_v29 = vmax.f32 %v433_v14, 0.0 }
 0x1b1   :  { %v1047_v7 = vpop.f32.mrf.mxu2 }
 0x1b2   :  { %v472_v8 = vmax.f32 %v403_v6, 0.0  ;;  %v1051_v9 = vadd.f32 %v1047_v7, %v1025_v59  ;;  %v479_v59 = vmax.f32 %v420_v55, 0.0  ;;  %v430_v6 = vadd.f32 %v2570_v26, %v2668_v37  ;;  %v2436_v55 = vld [vmem:[%s2909_s5 + $0x10] sm:$0xff] }
 0x1b3   :  { %v482_v7 = vmax.f32 %v428_v5, 0.0 }
 0x1b4   :  { %v521_v12 = vpack.c.bf16 %v472_v8, %v472_v8  ;;  %v528_v1 = vpack.c.bf16 %v479_v59, %v479_v59  ;;  %v483_v8 = vmax.f32 %v430_v6, 0.0 }
 0x1b6   :  { %2257 = vmatmul.msk.bf16.vlgmr.msrb.gmra.mxu1 %vm545_vm2, %v521_v12  ;;  %v531_v12 = vpack.c.bf16 %v482_v7, %v482_v7 }
 0x1b7   :  { %v404_v13 = vpop.f32.mrf.mxu0  ;;  %1643 = vmatpush.bf16.msrb.mxu1 %v2427_v10 }
 0x1b8   :  { %v405_v16 = vadd.f32 %v2570_v26, %v404_v13  ;;  %v532_v13 = vpack.c.bf16 %v483_v8, %v483_v8 }
 0x1b9   :  { %v1049_v17 = vpop.f32.mrf.mxu2  ;;  %v1073_v18 = vpop.f32.mrf.mxu3 }
 0x1ba   :  { %v473_v19 = vmax.f32 %v405_v16, 0.0  ;;  %v1077_v20 = vadd.f32 %v1073_v18, %v1051_v9  ;;  %v533_v18 = vpack.c.bf16 %v484_v29, %v484_v29 }
 0x1bb   :  { %v1099_v21 = vpop.f32.mrf.mxu1 }
 0x1bc   :  { %v522_v27 = vpack.c.bf16 %v473_v19, %v473_v19  ;;  %v1103_v28 = vadd.f32 %v1099_v21, %v1077_v20 }
 0x1be   :  { %2264 = vmatmul.msk.bf16.vlgmr.msrb.gmra.mxu2 %vm545_vm2, %v522_v27  ;;  %2271 = vmatmul.msk.bf16.vlgmr.msrb.gmra.mxu3 %vm545_vm2, %v523_v24 }
 0x1bf   :  { %1669 = vmatpush.bf16.msrb.mxu2 %v2428_v23  ;;  %1695 = vmatpush.bf16.msrb.mxu3 %v2429_v57 }
 0x1c1   :  { %v1075_v31 = vpop.f32.mrf.mxu3 }
 0x1c3   :  { %v1101_v32 = vpop.f32.mrf.mxu1 }
 0x1c6   :  { %2278 = vmatmul.msk.bf16.vlgmr.msra.gmra.mxu1 %vm545_vm2, %v524_v35 }
 0x1c7   :  { %1721 = vmatpush.bf16.msra.mxu1 %v2430_v33 }
 0x1c9   :  { %v1125_v40 = vpop.f32.mrf.mxu2 }
 0x1ca   :  { %v1129_v41 = vadd.f32 %v1125_v40, %v1103_v28 }
 0x1ce   :  { %2285 = vmatmul.msk.bf16.vlgmr.msra.gmra.mxu2 %vm545_vm2, %v525_v36  ;;  %2292 = vmatmul.msk.bf16.vlgmr.msra.gmra.mxu3 %vm545_vm2, %v526_v45 }
 0x1cf   :  { %1747 = vmatpush.bf16.msra.mxu2 %v2431_v42  ;;  %1773 = vmatpush.bf16.msra.mxu3 %v2432_v44 }
 0x1d1   :  { %v1127_v48 = vpop.f32.mrf.mxu2  ;;  %v1151_v49 = vpop.f32.mrf.mxu3 }
 0x1d2   :  { %v1155_v50 = vadd.f32 %v1151_v49, %v1129_v41 }
 0x1d3   :  { %v1177_v51 = vpop.f32.mrf.mxu1 }
 0x1d4   :  { %v1181_v56 = vadd.f32 %v1177_v51, %v1155_v50  ;;  %v2437_v50 = vld [vmem:[%s2909_s5 + $0x18] sm:$0xff] }
 0x1d6   :  { %2299 = vmatmul.msk.bf16.vlgmr.msrb.gmra.mxu1 %vm545_vm2, %v527_v54 }
 0x1d7   :  { %1799 = vmatpush.bf16.msrb.mxu1 %v2433_v52 }
 0x1d9   :  { %v1153_v60 = vpop.f32.mrf.mxu3 }
 0x1da   :  { %v2435_v60 = vld [vmem:[%s2909_s5 + $0x8] sm:$0xff] }
 0x1db   :  { %v1179_v61 = vpop.f32.mrf.mxu1 }
 0x1de   :  { %2306 = vmatmul.msk.bf16.vlgmr.msrb.gmra.mxu2 %vm545_vm2, %v528_v1  ;;  %2313 = vmatmul.msk.bf16.vlgmr.msrb.gmra.mxu3 %vm545_vm2, %v529_v62  ;;  %v2434_v1 = vld [vmem:[%s2909_s5] sm:$0xff] }
 0x1df   :  { %1857 = vmatpush.bf16.msrb.mxu2 %v2437_v50 }
 0x1e1   :  { %v1203_v3 = vpop.f32.mrf.mxu2 }
 0x1e2   :  { %v1207_v0 = vadd.f32 %v1203_v3, %v1181_v56 }
 0x1e3   :  { %1858 = vmatpush.bf16.msrb.mxu2 %v2436_v55 }
 0x1e6   :  { %2320 = vmatmul.msk.bf16.vlgmr.msra.gmra.mxu1 %vm545_vm2, %v530_v4 }
 0x1e7   :  { %1859 = vmatpush.bf16.msrb.mxu2 %v2435_v60 }
 0x1e9   :  { %v1205_v22 = vpop.f32.mrf.mxu2  ;;  %v1229_v9 = vpop.f32.mrf.mxu3 }
 0x1ea   :  { %v1233_v10 = vadd.f32 %v1229_v9, %v1207_v0 }
 0x1eb   :  { %v1255_v11 = vpop.f32.mrf.mxu1  ;;  %1860 = vmatpush.bf16.msrb.mxu2 %v2434_v1 }
 0x1ec   :  { %v1259_v16 = vadd.f32 %v1255_v11, %v1233_v10 }
 0x1ee   :  { %2327 = vmatmul.msk.bf16.vlgmr.msra.gmra.mxu2 %vm545_vm2, %v531_v12  ;;  %2334 = vmatmul.msk.bf16.vlgmr.msra.gmra.mxu3 %vm545_vm2, %v532_v13 }
 0x1f1   :  { %v1231_v37 = vpop.f32.mrf.mxu3 }
 0x1f3   :  { %v1257_v17 = vpop.f32.mrf.mxu1 }
 0x1f6   :  { %2341 = vmatmul.msk.bf16.vlgmr.msrb.gmra.mxu1 %vm545_vm2, %v533_v18  ;;  %v2448_v18 = vld [vmem:[%s2907_s4] ss:$0 sm:$0xff] }
 0x1f9   :  { %v1281_v19 = vpop.f32.mrf.mxu2 }
 0x1fa   :  { %v1285_v20 = vadd.f32 %v1281_v19, %v1259_v16 }
 0x201   :  { %v1283_v21 = vpop.f32.mrf.mxu2  ;;  %v1307_v23 = vpop.f32.mrf.mxu3 }
 0x202   :  { %v1311_v57 = vadd.f32 %v1307_v23, %v1285_v20 }
 0x203   :  { %v1333_v24 = vpop.f32.mrf.mxu1 }
 0x204   :  { %v1337_v25 = vadd.f32 %v1333_v24, %v1311_v57 }
 0x209   :  { %v1309_v27 = vpop.f32.mrf.mxu3 }
 0x20a   :  { %v2449_v27 = vld [vmem:[%s2908_s6] ss:$0 sm:$0xff] }
 0x20b   :  { %v1335_v26 = vpop.f32.mrf.mxu1 }
 0x211   :  { %v1359_v43 = vpop.f32.mrf.mxu2 }
 0x212   :  { %v1363_v28 = vadd.f32 %v1359_v43, %v1337_v25 }
 0x219   :  { %v1361_v30 = vpop.f32.mrf.mxu2  ;;  %v1385_v31 = vpop.f32.mrf.mxu3 }
 0x21a   :  { %v1389_v45 = vadd.f32 %v1385_v31, %v1363_v28 }
 0x21b   :  { %v1411_v32 = vpop.f32.mrf.mxu1 }
 0x21c   :  { %v1415_v48 = vadd.f32 %v1411_v32, %v1389_v45 }
 0x221   :  { %v1387_v33 = vpop.f32.mrf.mxu3 }
 0x223   :  { %v1413_v34 = vpop.f32.mrf.mxu1 }
 0x229   :  { %v1437_v2 = vpop.f32.mrf.mxu2 }
 0x22a   :  { %v1441_v51 = vadd.f32 %v1437_v2, %v1415_v48 }
 0x231   :  { %v1439_v35 = vpop.f32.mrf.mxu2  ;;  %v1463_v38 = vpop.f32.mrf.mxu3 }
 0x232   :  { %v1467_v52 = vadd.f32 %v1463_v38, %v1441_v51 }
 0x233   :  { %v1489_v39 = vpop.f32.mrf.mxu1 }
 0x234   :  { %v1493_v56 = vadd.f32 %v1489_v39, %v1467_v52 }
 0x239   :  { %v1465_v40 = vpop.f32.mrf.mxu3 }
 0x23b   :  { %v1491_v41 = vpop.f32.mrf.mxu1 }
 0x241   :  { %v1515_v42 = vpop.f32.mrf.mxu2  ;;  %v1541_v44 = vpop.f32.mrf.mxu3 }
 0x242   :  { %v1519_v59 = vadd.f32 %v1515_v42, %v1493_v56 }
 0x243   :  { %v1567_v36 = vpop.f32.mrf.mxu1 }
 0x244   :  { %v1545_v61 = vadd.f32 %v1541_v44, %v1519_v59 }
 0x246   :  { %v1571_v3 = vadd.f32 %v1567_v36, %v1545_v61 }
 0x249   :  { %v1517_v46 = vpop.f32.mrf.mxu2  ;;  %v1543_v47 = vpop.f32.mrf.mxu3 }
 0x24b   :  { %v1569_v49 = vpop.f32.mrf.mxu1 }
 0x251   :  { %v1593_v53 = vpop.f32.mrf.mxu2  ;;  %v1619_v54 = vpop.f32.mrf.mxu3 }
 0x252   :  { %v1597_v0 = vadd.f32 %v1593_v53, %v1571_v3 }
 0x253   :  { %v1645_v58 = vpop.f32.mrf.mxu1 }
 0x254   :  { %v1623_v6 = vadd.f32 %v1619_v54, %v1597_v0 }
 0x256   :  { %v1649_v8 = vadd.f32 %v1645_v58, %v1623_v6 }
 0x259   :  { %v1595_v62 = vpop.f32.mrf.mxu2  ;;  %v1621_v63 = vpop.f32.mrf.mxu3 }
 0x25b   :  { %v1647_v15 = vpop.f32.mrf.mxu1 }
 0x261   :  { %v1671_v4 = vpop.f32.mrf.mxu2  ;;  %v1697_v5 = vpop.f32.mrf.mxu3 }
 0x262   :  { %v1675_v22 = vadd.f32 %v1671_v4, %v1649_v8 }
 0x263   :  { %v1723_v7 = vpop.f32.mrf.mxu1 }
 0x264   :  { %v1701_v12 = vadd.f32 %v1697_v5, %v1675_v22 }
 0x266   :  { %v1727_v13 = vadd.f32 %v1723_v7, %v1701_v12 }
 0x269   :  { %v1673_v9 = vpop.f32.mrf.mxu2  ;;  %v1699_v10 = vpop.f32.mrf.mxu3 }
 0x26b   :  { %v1725_v11 = vpop.f32.mrf.mxu1 }
 0x271   :  { %v1749_v14 = vpop.f32.mrf.mxu2  ;;  %v1775_v16 = vpop.f32.mrf.mxu3 }
 0x272   :  { %v1753_v29 = vadd.f32 %v1749_v14, %v1727_v13 }
 0x273   :  { %v1801_v37 = vpop.f32.mrf.mxu1 }
 0x274   :  { %v1779_v17 = vadd.f32 %v1775_v16, %v1753_v29 }
 0x276   :  { %v1805_v19 = vadd.f32 %v1801_v37, %v1779_v17 }
 0x278   :  { %v1810_v20 = vadd.f32 %v2448_v18, %v1805_v19 }
 0x279   :  { %v1751_v21 = vpop.f32.mrf.mxu2  ;;  %v1777_v23 = vpop.f32.mrf.mxu3 }
 0x27a   :  { %v1811_v57 = vmax.f32 %v1810_v20, 0.0 }
 0x27b   :  { %v1803_v24 = vpop.f32.mrf.mxu1 }
 0x27c   :  { %v1812_v25 = vpack.c.bf16 %v1811_v57, %v1811_v57 }
 0x27e   :  { %2358 = vmatmul.msk.bf16.vlgmr.msrb.gmra.mxu2 %vm1849_vm3, %v1812_v25 }
 0x301   :  { %v1862_v26 = vpop.f32.mrf.mxu2 }
 0x302   :  { %v1863_v43 = vadd.f32 %v2449_v27, %v1862_v26 }
 0x304   :  { %1867 = vst.msk [vmem:[%s2910_s7] sm:$0xff] %vm1866_vm4, %v1863_v43 }
 0x309   :  { %v1864_v28 = vpop.f32.mrf.mxu2 }

</bundles_post_ra>
